<compile_context>
chip_gen: v7x
topology: tpu7x:2x2x1
jax: 0.10.0
libtpu: 0.0.40
codegen_flags: <defaults>
</compile_context>

<pallas_src>
import numpy as np

import jax
import jax.numpy as jnp
from jax.experimental import pallas as pl
from jax.experimental.pallas import tpu as pltpu

NEG_SLOPE = 0.1   # LeakyReLU negative slope
BN_EPS = 1e-5
_PAD_WIDTH = 128  # lane-dense interior feature width
_MIN_TILE = 256   # batch-tile granularity (full MXU passes on v6e/v7x)

# Per-Linear-layer flag: True => followed by BatchNorm1d + LeakyReLU(0.1)
# (Dropout after the first block is identity in eval mode).
_ACT_PLAN = [True, True, True, True, False,    # encoder
             True, True, True, True, False]    # decoder
_DIMS = lambda d: [d, 128, 64, 32, 16, 8, 16, 32, 64, 128, d]


def _round_up(x, m):
    return ((x + m - 1) // m) * m


# -----------------------------------------------------------------------------
# Kernel
# -----------------------------------------------------------------------------
def _autoencoder_kernel(x_ref, *refs):
    """refs = (w0, b0, w1, b1, ..., w9, b9, out_ref).

    w_i: (in_i, out_i) in the compute dtype (bf16 or f32), BN scale pre-folded,
         interior dims zero-padded to 128.
    b_i: (1, out_i) float32, BN shift pre-folded, padded lanes exactly 0.
    """
    o_ref = refs[-1]
    params = refs[:-1]

    h = x_ref[...]
    for li, has_act in enumerate(_ACT_PLAN):
        w = params[2 * li][...]
        b = params[2 * li + 1][...]
        # MXU matmul in the weight dtype, f32 accumulation; epilogue in f32.
        h = jnp.dot(h.astype(w.dtype), w, preferred_element_type=jnp.float32) + b
        if has_act:
            h = jnp.where(h > 0, h, NEG_SLOPE * h)   # LeakyReLU(0.1)
        # Dropout(0.2): identity in eval mode.
    o_ref[...] = h.astype(o_ref.dtype)


# -----------------------------------------------------------------------------
# Wrapper
# -----------------------------------------------------------------------------
def autoencoder_forward(x, params_flat, *, block_batch=2048, out_dtype=None):
    """x: (B, D) float32/bfloat16.  params_flat: from fold_params()."""
    B, D = x.shape
    out_dtype = x.dtype if out_dtype is None else out_dtype

    # Batch tile:
    #  * small batches -> one full-batch grid step;
    #  * otherwise >=2 grid steps (v7x: both TensorCores busy), tile a multiple
    #    of 256 rows, capped at block_batch to amortize per-step overhead.
    if B < 2 * _MIN_TILE:
        TB = B
    else:
        TB = min(block_batch, _round_up(pl.cdiv(B, 2), _MIN_TILE))
    grid = (pl.cdiv(B, TB),)

    in_specs = [pl.BlockSpec((TB, D), lambda i: (i, 0))]
    # Parameters: whole-array blocks with a constant index_map -> resident in
    # VMEM, DMA'd once, never re-fetched across grid steps.
    in_specs += [pl.BlockSpec(p.shape, lambda i: (0, 0)) for p in params_flat]
    out_spec = pl.BlockSpec((TB, D), lambda i: (i, 0))

    # Advisory cost for XLA scheduling around the custom call.
    flops = sum(2 * B * int(w.shape[0]) * int(w.shape[1])
                for w in params_flat[0::2])
    param_bytes = sum(int(p.size) * p.dtype.itemsize for p in params_flat)
    bytes_accessed = (int(x.size) * x.dtype.itemsize
                      + B * D * jnp.dtype(out_dtype).itemsize
                      + param_bytes)
    cost = pl.CostEstimate(flops=flops, transcendentals=0,
                           bytes_accessed=bytes_accessed)

    return pl.pallas_call(
        _autoencoder_kernel,
        out_shape=jax.ShapeDtypeStruct((B, D), out_dtype),
        grid=grid,
        in_specs=in_specs,
        out_specs=out_spec,
        cost_estimate=cost,
        compiler_params=pltpu.CompilerParams(
            # Batch grid steps are independent: shard across v7x's 2 TCs.
            dimension_semantics=("parallel",),
            # Tiny footprint (<= a few MiB even at TB=2048); 32 MiB is safe on
            # v5e/v6e (128 MiB physical) and v7x (64 MiB physical).
            vmem_limit_bytes=32 * 1024 * 1024,
        ),
    )(x, *params_flat)


# -----------------------------------------------------------------------------
# Parameters (synthetic, deterministic) + BN folding + lane padding
# -----------------------------------------------------------------------------
def init_raw_params(key, input_dim, dtype=jnp.float32):
    """PyTorch-style raw parameters: Linear (W transposed to (in,out), b) and
    BatchNorm1d running stats / affine params where present."""
    dims = _DIMS(input_dim)
    layers = []
    for li, has_bn in enumerate(_ACT_PLAN):
        fan_in, fan_out = dims[li], dims[li + 1]
        key, kw, kb, kg, kbt, km, kv = jax.random.split(key, 7)
        bound = 1.0 / (fan_in ** 0.5)
        layer = {
            "w": jax.random.uniform(kw, (fan_in, fan_out), dtype, -bound, bound),
            "b": jax.random.uniform(kb, (fan_out,), dtype, -bound, bound),
        }
        if has_bn:
            layer.update(
                gamma=1.0 + 0.1 * jax.random.normal(kg, (fan_out,), dtype),
                beta=0.1 * jax.random.normal(kbt, (fan_out,), dtype),
                mean=0.1 * jax.random.normal(km, (fan_out,), dtype),
                var=1.0 + 0.1 * jax.random.uniform(kv, (fan_out,), dtype),
            )
        layers.append(layer)
    return layers


def fold_params(raw_layers, compute_dtype=jnp.bfloat16):
    """Fold eval-mode BatchNorm into the preceding Linear, zero-pad interior
    feature widths to 128 (lane-dense MXU operands, bit-exact), and cast
    weights to the MXU compute dtype (bf16 on all generations); biases f32."""
    n = len(raw_layers)
    flat = []
    for li, layer in enumerate(raw_layers):
        w = layer["w"].astype(jnp.float32)
        b = layer["b"].astype(jnp.float32)
        if "gamma" in layer:
            scale = (layer["gamma"].astype(jnp.float32)
                     / jnp.sqrt(layer["var"].astype(jnp.float32) + BN_EPS))
            shift = (layer["beta"].astype(jnp.float32)
                     - layer["mean"].astype(jnp.float32) * scale)
            w = w * scale[None, :]
            b = b * scale + shift
        fan_in, fan_out = w.shape
        # Keep first-layer input and last-layer output at D (HBM traffic
        # unchanged); pad all interior widths to 128.
        pad_in = fan_in if li == 0 else max(fan_in, _PAD_WIDTH)
        pad_out = fan_out if li == n - 1 else max(fan_out, _PAD_WIDTH)
        w_p = jnp.zeros((pad_in, pad_out), jnp.float32).at[:fan_in, :fan_out].set(w)
        b_p = jnp.zeros((pad_out,), jnp.float32).at[:fan_out].set(b)
        flat.append(w_p.astype(compute_dtype))
        flat.append(b_p.reshape(1, -1))          # stays float32
    return flat


# -----------------------------------------------------------------------------
# Host-side float64 reference with PyTorch eval semantics (unfolded, unpadded)
# -----------------------------------------------------------------------------
def reference_forward_np(x, raw_layers):
    h = np.asarray(x, dtype=np.float64)
    for layer in raw_layers:
        w = np.asarray(layer["w"], np.float64)
        b = np.asarray(layer["b"], np.float64)
        h = h @ w + b
        if "gamma" in layer:
            inv = 1.0 / np.sqrt(np.asarray(layer["var"], np.float64) + BN_EPS)
            h = ((h - np.asarray(layer["mean"], np.float64)) * inv
                 * np.asarray(layer["gamma"], np.float64)
                 + np.asarray(layer["beta"], np.float64))
            h = np.where(h > 0, h, NEG_SLOPE * h)
    return h


# TODO(synk): training-mode Dropout / batch-statistics BatchNorm are not
# implemented; this fused kernel covers eval/inference semantics only.

if __name__ == "__main__":
    input_dim = 32

    key = jax.random.PRNGKey(0)
    key_x, key_x2, key_p = jax.random.split(key, 3)
    raw = init_raw_params(key_p, input_dim)

    fwd = jax.jit(autoencoder_forward)

    # --- Small batch (single grid step), bf16 weights (production path).
    x_small = jax.random.normal(key_x, (8, input_dim), jnp.float32)
    ref_small = reference_forward_np(np.asarray(x_small), raw)

    params_bf16 = fold_params(raw, jnp.bfloat16)
    out_bf16 = jax.block_until_ready(fwd(x_small, params_bf16))
    assert out_bf16.shape == (8, input_dim)
    assert np.allclose(np.asarray(out_bf16, np.float64), ref_small,
                       atol=5e-2, rtol=5e-2), "bf16 small-batch mismatch"

    # --- Same batch with f32 weights (validates BN folding / padding exactly
    # up to TPU matmul precision).
    params_f32 = fold_params(raw, jnp.float32)
    out_f32 = jax.block_until_ready(fwd(x_small, params_f32))
    assert out_f32.shape == (8, input_dim)
    assert np.allclose(np.asarray(out_f32, np.float64), ref_small,
                       atol=5e-2, rtol=5e-2), "f32 small-batch mismatch"

    # --- Partial last batch tile: B=700 -> TB=512, grid=(2,); second tile is
    # partial and exercises the clipped block-write path.
    x_big = jax.random.normal(key_x2, (700, input_dim), jnp.float32)
    ref_big = reference_forward_np(np.asarray(x_big), raw)
    out_big = jax.block_until_ready(fwd(x_big, params_bf16))
    assert out_big.shape == (700, input_dim)
    assert np.allclose(np.asarray(out_big, np.float64), ref_big,
                       atol=5e-2, rtol=5e-2), "partial-tile mismatch"

    print("KERNEL_OK")
</pallas_src>

<mosaic_0001>
module attributes {stable_mosaic.version = 11 : i64} {
  func.func @_autoencoder_kernel(%arg0: i32, %arg1: memref<8x32xf32, #tpu.memory_space<vmem>>, %arg2: memref<32x128xbf16, #tpu.memory_space<vmem>>, %arg3: memref<1x128xf32, #tpu.memory_space<vmem>>, %arg4: memref<128x128xbf16, #tpu.memory_space<vmem>>, %arg5: memref<1x128xf32, #tpu.memory_space<vmem>>, %arg6: memref<128x128xbf16, #tpu.memory_space<vmem>>, %arg7: memref<1x128xf32, #tpu.memory_space<vmem>>, %arg8: memref<128x128xbf16, #tpu.memory_space<vmem>>, %arg9: memref<1x128xf32, #tpu.memory_space<vmem>>, %arg10: memref<128x128xbf16, #tpu.memory_space<vmem>>, %arg11: memref<1x128xf32, #tpu.memory_space<vmem>>, %arg12: memref<128x128xbf16, #tpu.memory_space<vmem>>, %arg13: memref<1x128xf32, #tpu.memory_space<vmem>>, %arg14: memref<128x128xbf16, #tpu.memory_space<vmem>>, %arg15: memref<1x128xf32, #tpu.memory_space<vmem>>, %arg16: memref<128x128xbf16, #tpu.memory_space<vmem>>, %arg17: memref<1x128xf32, #tpu.memory_space<vmem>>, %arg18: memref<128x128xbf16, #tpu.memory_space<vmem>>, %arg19: memref<1x128xf32, #tpu.memory_space<vmem>>, %arg20: memref<128x32xbf16, #tpu.memory_space<vmem>>, %arg21: memref<1x32xf32, #tpu.memory_space<vmem>>, %arg22: memref<8x32xf32, #tpu.memory_space<vmem>>) attributes {dimension_semantics = [#tpu.dimension_semantics<parallel>], iteration_bounds = array<i64: 1>, scalar_prefetch = 0 : i64, scratch_operands = 0 : i64, tpu.core_type = #tpu.core_type<tc>, window_params = [{transform_indices = @transform_0, window_bounds = array<i64: 8, 32>}, {pipeline_mode = #tpu.pipeline_mode<synchronous>, transform_indices = @transform_1, window_bounds = array<i64: 32, 128>}, {pipeline_mode = #tpu.pipeline_mode<synchronous>, transform_indices = @transform_2, window_bounds = array<i64: 1, 128>}, {pipeline_mode = #tpu.pipeline_mode<synchronous>, transform_indices = @transform_3, window_bounds = array<i64: 128, 128>}, {pipeline_mode = #tpu.pipeline_mode<synchronous>, transform_indices = @transform_4, window_bounds = array<i64: 1, 128>}, {pipeline_mode = #tpu.pipeline_mode<synchronous>, transform_indices = @transform_5, window_bounds = array<i64: 128, 128>}, {pipeline_mode = #tpu.pipeline_mode<synchronous>, transform_indices = @transform_6, window_bounds = array<i64: 1, 128>}, {pipeline_mode = #tpu.pipeline_mode<synchronous>, transform_indices = @transform_7, window_bounds = array<i64: 128, 128>}, {pipeline_mode = #tpu.pipeline_mode<synchronous>, transform_indices = @transform_8, window_bounds = array<i64: 1, 128>}, {pipeline_mode = #tpu.pipeline_mode<synchronous>, transform_indices = @transform_9, window_bounds = array<i64: 128, 128>}, {pipeline_mode = #tpu.pipeline_mode<synchronous>, transform_indices = @transform_10, window_bounds = array<i64: 1, 128>}, {pipeline_mode = #tpu.pipeline_mode<synchronous>, transform_indices = @transform_11, window_bounds = array<i64: 128, 128>}, {pipeline_mode = #tpu.pipeline_mode<synchronous>, transform_indices = @transform_12, window_bounds = array<i64: 1, 128>}, {pipeline_mode = #tpu.pipeline_mode<synchronous>, transform_indices = @transform_13, window_bounds = array<i64: 128, 128>}, {pipeline_mode = #tpu.pipeline_mode<synchronous>, transform_indices = @transform_14, window_bounds = array<i64: 1, 128>}, {pipeline_mode = #tpu.pipeline_mode<synchronous>, transform_indices = @transform_15, window_bounds = array<i64: 128, 128>}, {pipeline_mode = #tpu.pipeline_mode<synchronous>, transform_indices = @transform_16, window_bounds = array<i64: 1, 128>}, {pipeline_mode = #tpu.pipeline_mode<synchronous>, transform_indices = @transform_17, window_bounds = array<i64: 128, 128>}, {pipeline_mode = #tpu.pipeline_mode<synchronous>, transform_indices = @transform_18, window_bounds = array<i64: 1, 128>}, {pipeline_mode = #tpu.pipeline_mode<synchronous>, transform_indices = @transform_19, window_bounds = array<i64: 128, 32>}, {pipeline_mode = #tpu.pipeline_mode<synchronous>, transform_indices = @transform_20, window_bounds = array<i64: 1, 32>}, {transform_indices = @transform_21, window_bounds = array<i64: 8, 32>}]} {
    %c0 = arith.constant 0 : index
    %c0_0 = arith.constant 0 : index
    %0 = vector.load %arg1[%c0, %c0_0] : memref<8x32xf32, #tpu.memory_space<vmem>>, vector<8x32xf32>
    %c0_1 = arith.constant 0 : index
    %c0_2 = arith.constant 0 : index
    %1 = vector.load %arg2[%c0_1, %c0_2] : memref<32x128xbf16, #tpu.memory_space<vmem>>, vector<32x128xbf16>
    %c0_3 = arith.constant 0 : index
    %c0_4 = arith.constant 0 : index
    %2 = vector.load %arg3[%c0_3, %c0_4] : memref<1x128xf32, #tpu.memory_space<vmem>>, vector<1x128xf32>
    %3 = arith.truncf %0 : vector<8x32xf32> to vector<8x32xbf16>
    %cst = arith.constant dense<0.000000e+00> : vector<8x128xf32>
    %4 = tpu.matmul %3, %1, %cst {dimension_numbers = #tpu.dot_dimension_numbers<[1], [0], [0], [1], [0, 0, 1, 1], [], []>} : vector<8x32xbf16>, vector<32x128xbf16>, vector<8x128xf32> -> vector<8x128xf32>
    %5 = vector.broadcast %2 : vector<1x128xf32> to vector<8x128xf32>
    %6 = arith.addf %4, %5 : vector<8x128xf32>
    %cst_5 = arith.constant 0.000000e+00 : f32
    %7 = vector.broadcast %cst_5 : f32 to vector<8x128xf32>
    %8 = arith.cmpf ogt, %6, %7 : vector<8x128xf32>
    %cst_6 = arith.constant 1.000000e-01 : f32
    %9 = vector.broadcast %cst_6 : f32 to vector<8x128xf32>
    %10 = arith.mulf %9, %6 : vector<8x128xf32>
    %11 = arith.select %8, %6, %10 : vector<8x128xi1>, vector<8x128xf32>
    %c0_7 = arith.constant 0 : index
    %c0_8 = arith.constant 0 : index
    %12 = vector.load %arg4[%c0_7, %c0_8] : memref<128x128xbf16, #tpu.memory_space<vmem>>, vector<128x128xbf16>
    %c0_9 = arith.constant 0 : index
    %c0_10 = arith.constant 0 : index
    %13 = vector.load %arg5[%c0_9, %c0_10] : memref<1x128xf32, #tpu.memory_space<vmem>>, vector<1x128xf32>
    %14 = arith.truncf %11 : vector<8x128xf32> to vector<8x128xbf16>
    %cst_11 = arith.constant dense<0.000000e+00> : vector<8x128xf32>
    %15 = tpu.matmul %14, %12, %cst_11 {dimension_numbers = #tpu.dot_dimension_numbers<[1], [0], [0], [1], [0, 0, 1, 1], [], []>} : vector<8x128xbf16>, vector<128x128xbf16>, vector<8x128xf32> -> vector<8x128xf32>
    %16 = vector.broadcast %13 : vector<1x128xf32> to vector<8x128xf32>
    %17 = arith.addf %15, %16 : vector<8x128xf32>
    %cst_12 = arith.constant 0.000000e+00 : f32
    %18 = vector.broadcast %cst_12 : f32 to vector<8x128xf32>
    %19 = arith.cmpf ogt, %17, %18 : vector<8x128xf32>
    %cst_13 = arith.constant 1.000000e-01 : f32
    %20 = vector.broadcast %cst_13 : f32 to vector<8x128xf32>
    %21 = arith.mulf %20, %17 : vector<8x128xf32>
    %22 = arith.select %19, %17, %21 : vector<8x128xi1>, vector<8x128xf32>
    %c0_14 = arith.constant 0 : index
    %c0_15 = arith.constant 0 : index
    %23 = vector.load %arg6[%c0_14, %c0_15] : memref<128x128xbf16, #tpu.memory_space<vmem>>, vector<128x128xbf16>
    %c0_16 = arith.constant 0 : index
    %c0_17 = arith.constant 0 : index
    %24 = vector.load %arg7[%c0_16, %c0_17] : memref<1x128xf32, #tpu.memory_space<vmem>>, vector<1x128xf32>
    %25 = arith.truncf %22 : vector<8x128xf32> to vector<8x128xbf16>
    %cst_18 = arith.constant dense<0.000000e+00> : vector<8x128xf32>
    %26 = tpu.matmul %25, %23, %cst_18 {dimension_numbers = #tpu.dot_dimension_numbers<[1], [0], [0], [1], [0, 0, 1, 1], [], []>} : vector<8x128xbf16>, vector<128x128xbf16>, vector<8x128xf32> -> vector<8x128xf32>
    %27 = vector.broadcast %24 : vector<1x128xf32> to vector<8x128xf32>
    %28 = arith.addf %26, %27 : vector<8x128xf32>
    %cst_19 = arith.constant 0.000000e+00 : f32
    %29 = vector.broadcast %cst_19 : f32 to vector<8x128xf32>
    %30 = arith.cmpf ogt, %28, %29 : vector<8x128xf32>
    %cst_20 = arith.constant 1.000000e-01 : f32
    %31 = vector.broadcast %cst_20 : f32 to vector<8x128xf32>
    %32 = arith.mulf %31, %28 : vector<8x128xf32>
    %33 = arith.select %30, %28, %32 : vector<8x128xi1>, vector<8x128xf32>
    %c0_21 = arith.constant 0 : index
    %c0_22 = arith.constant 0 : index
    %34 = vector.load %arg8[%c0_21, %c0_22] : memref<128x128xbf16, #tpu.memory_space<vmem>>, vector<128x128xbf16>
    %c0_23 = arith.constant 0 : index
    %c0_24 = arith.constant 0 : index
    %35 = vector.load %arg9[%c0_23, %c0_24] : memref<1x128xf32, #tpu.memory_space<vmem>>, vector<1x128xf32>
    %36 = arith.truncf %33 : vector<8x128xf32> to vector<8x128xbf16>
    %cst_25 = arith.constant dense<0.000000e+00> : vector<8x128xf32>
    %37 = tpu.matmul %36, %34, %cst_25 {dimension_numbers = #tpu.dot_dimension_numbers<[1], [0], [0], [1], [0, 0, 1, 1], [], []>} : vector<8x128xbf16>, vector<128x128xbf16>, vector<8x128xf32> -> vector<8x128xf32>
    %38 = vector.broadcast %35 : vector<1x128xf32> to vector<8x128xf32>
    %39 = arith.addf %37, %38 : vector<8x128xf32>
    %cst_26 = arith.constant 0.000000e+00 : f32
    %40 = vector.broadcast %cst_26 : f32 to vector<8x128xf32>
    %41 = arith.cmpf ogt, %39, %40 : vector<8x128xf32>
    %cst_27 = arith.constant 1.000000e-01 : f32
    %42 = vector.broadcast %cst_27 : f32 to vector<8x128xf32>
    %43 = arith.mulf %42, %39 : vector<8x128xf32>
    %44 = arith.select %41, %39, %43 : vector<8x128xi1>, vector<8x128xf32>
    %c0_28 = arith.constant 0 : index
    %c0_29 = arith.constant 0 : index
    %45 = vector.load %arg10[%c0_28, %c0_29] : memref<128x128xbf16, #tpu.memory_space<vmem>>, vector<128x128xbf16>
    %c0_30 = arith.constant 0 : index
    %c0_31 = arith.constant 0 : index
    %46 = vector.load %arg11[%c0_30, %c0_31] : memref<1x128xf32, #tpu.memory_space<vmem>>, vector<1x128xf32>
    %47 = arith.truncf %44 : vector<8x128xf32> to vector<8x128xbf16>
    %cst_32 = arith.constant dense<0.000000e+00> : vector<8x128xf32>
    %48 = tpu.matmul %47, %45, %cst_32 {dimension_numbers = #tpu.dot_dimension_numbers<[1], [0], [0], [1], [0, 0, 1, 1], [], []>} : vector<8x128xbf16>, vector<128x128xbf16>, vector<8x128xf32> -> vector<8x128xf32>
    %49 = vector.broadcast %46 : vector<1x128xf32> to vector<8x128xf32>
    %50 = arith.addf %48, %49 : vector<8x128xf32>
    %c0_33 = arith.constant 0 : index
    %c0_34 = arith.constant 0 : index
    %51 = vector.load %arg12[%c0_33, %c0_34] : memref<128x128xbf16, #tpu.memory_space<vmem>>, vector<128x128xbf16>
    %c0_35 = arith.constant 0 : index
    %c0_36 = arith.constant 0 : index
    %52 = vector.load %arg13[%c0_35, %c0_36] : memref<1x128xf32, #tpu.memory_space<vmem>>, vector<1x128xf32>
    %53 = arith.truncf %50 : vector<8x128xf32> to vector<8x128xbf16>
    %cst_37 = arith.constant dense<0.000000e+00> : vector<8x128xf32>
    %54 = tpu.matmul %53, %51, %cst_37 {dimension_numbers = #tpu.dot_dimension_numbers<[1], [0], [0], [1], [0, 0, 1, 1], [], []>} : vector<8x128xbf16>, vector<128x128xbf16>, vector<8x128xf32> -> vector<8x128xf32>
    %55 = vector.broadcast %52 : vector<1x128xf32> to vector<8x128xf32>
    %56 = arith.addf %54, %55 : vector<8x128xf32>
    %cst_38 = arith.constant 0.000000e+00 : f32
    %57 = vector.broadcast %cst_38 : f32 to vector<8x128xf32>
    %58 = arith.cmpf ogt, %56, %57 : vector<8x128xf32>
    %cst_39 = arith.constant 1.000000e-01 : f32
    %59 = vector.broadcast %cst_39 : f32 to vector<8x128xf32>
    %60 = arith.mulf %59, %56 : vector<8x128xf32>
    %61 = arith.select %58, %56, %60 : vector<8x128xi1>, vector<8x128xf32>
    %c0_40 = arith.constant 0 : index
    %c0_41 = arith.constant 0 : index
    %62 = vector.load %arg14[%c0_40, %c0_41] : memref<128x128xbf16, #tpu.memory_space<vmem>>, vector<128x128xbf16>
    %c0_42 = arith.constant 0 : index
    %c0_43 = arith.constant 0 : index
    %63 = vector.load %arg15[%c0_42, %c0_43] : memref<1x128xf32, #tpu.memory_space<vmem>>, vector<1x128xf32>
    %64 = arith.truncf %61 : vector<8x128xf32> to vector<8x128xbf16>
    %cst_44 = arith.constant dense<0.000000e+00> : vector<8x128xf32>
    %65 = tpu.matmul %64, %62, %cst_44 {dimension_numbers = #tpu.dot_dimension_numbers<[1], [0], [0], [1], [0, 0, 1, 1], [], []>} : vector<8x128xbf16>, vector<128x128xbf16>, vector<8x128xf32> -> vector<8x128xf32>
    %66 = vector.broadcast %63 : vector<1x128xf32> to vector<8x128xf32>
    %67 = arith.addf %65, %66 : vector<8x128xf32>
    %cst_45 = arith.constant 0.000000e+00 : f32
    %68 = vector.broadcast %cst_45 : f32 to vector<8x128xf32>
    %69 = arith.cmpf ogt, %67, %68 : vector<8x128xf32>
    %cst_46 = arith.constant 1.000000e-01 : f32
    %70 = vector.broadcast %cst_46 : f32 to vector<8x128xf32>
    %71 = arith.mulf %70, %67 : vector<8x128xf32>
    %72 = arith.select %69, %67, %71 : vector<8x128xi1>, vector<8x128xf32>
    %c0_47 = arith.constant 0 : index
    %c0_48 = arith.constant 0 : index
    %73 = vector.load %arg16[%c0_47, %c0_48] : memref<128x128xbf16, #tpu.memory_space<vmem>>, vector<128x128xbf16>
    %c0_49 = arith.constant 0 : index
    %c0_50 = arith.constant 0 : index
    %74 = vector.load %arg17[%c0_49, %c0_50] : memref<1x128xf32, #tpu.memory_space<vmem>>, vector<1x128xf32>
    %75 = arith.truncf %72 : vector<8x128xf32> to vector<8x128xbf16>
    %cst_51 = arith.constant dense<0.000000e+00> : vector<8x128xf32>
    %76 = tpu.matmul %75, %73, %cst_51 {dimension_numbers = #tpu.dot_dimension_numbers<[1], [0], [0], [1], [0, 0, 1, 1], [], []>} : vector<8x128xbf16>, vector<128x128xbf16>, vector<8x128xf32> -> vector<8x128xf32>
    %77 = vector.broadcast %74 : vector<1x128xf32> to vector<8x128xf32>
    %78 = arith.addf %76, %77 : vector<8x128xf32>
    %cst_52 = arith.constant 0.000000e+00 : f32
    %79 = vector.broadcast %cst_52 : f32 to vector<8x128xf32>
    %80 = arith.cmpf ogt, %78, %79 : vector<8x128xf32>
    %cst_53 = arith.constant 1.000000e-01 : f32
    %81 = vector.broadcast %cst_53 : f32 to vector<8x128xf32>
    %82 = arith.mulf %81, %78 : vector<8x128xf32>
    %83 = arith.select %80, %78, %82 : vector<8x128xi1>, vector<8x128xf32>
    %c0_54 = arith.constant 0 : index
    %c0_55 = arith.constant 0 : index
    %84 = vector.load %arg18[%c0_54, %c0_55] : memref<128x128xbf16, #tpu.memory_space<vmem>>, vector<128x128xbf16>
    %c0_56 = arith.constant 0 : index
    %c0_57 = arith.constant 0 : index
    %85 = vector.load %arg19[%c0_56, %c0_57] : memref<1x128xf32, #tpu.memory_space<vmem>>, vector<1x128xf32>
    %86 = arith.truncf %83 : vector<8x128xf32> to vector<8x128xbf16>
    %cst_58 = arith.constant dense<0.000000e+00> : vector<8x128xf32>
    %87 = tpu.matmul %86, %84, %cst_58 {dimension_numbers = #tpu.dot_dimension_numbers<[1], [0], [0], [1], [0, 0, 1, 1], [], []>} : vector<8x128xbf16>, vector<128x128xbf16>, vector<8x128xf32> -> vector<8x128xf32>
    %88 = vector.broadcast %85 : vector<1x128xf32> to vector<8x128xf32>
    %89 = arith.addf %87, %88 : vector<8x128xf32>
    %cst_59 = arith.constant 0.000000e+00 : f32
    %90 = vector.broadcast %cst_59 : f32 to vector<8x128xf32>
    %91 = arith.cmpf ogt, %89, %90 : vector<8x128xf32>
    %cst_60 = arith.constant 1.000000e-01 : f32
    %92 = vector.broadcast %cst_60 : f32 to vector<8x128xf32>
    %93 = arith.mulf %92, %89 : vector<8x128xf32>
    %94 = arith.select %91, %89, %93 : vector<8x128xi1>, vector<8x128xf32>
    %c0_61 = arith.constant 0 : index
    %c0_62 = arith.constant 0 : index
    %95 = vector.load %arg20[%c0_61, %c0_62] : memref<128x32xbf16, #tpu.memory_space<vmem>>, vector<128x32xbf16>
    %c0_63 = arith.constant 0 : index
    %c0_64 = arith.constant 0 : index
    %96 = vector.load %arg21[%c0_63, %c0_64] : memref<1x32xf32, #tpu.memory_space<vmem>>, vector<1x32xf32>
    %97 = arith.truncf %94 : vector<8x128xf32> to vector<8x128xbf16>
    %cst_65 = arith.constant dense<0.000000e+00> : vector<8x32xf32>
    %98 = tpu.matmul %97, %95, %cst_65 {dimension_numbers = #tpu.dot_dimension_numbers<[1], [0], [0], [1], [0, 0, 1, 1], [], []>} : vector<8x128xbf16>, vector<128x32xbf16>, vector<8x32xf32> -> vector<8x32xf32>
    %99 = vector.broadcast %96 : vector<1x32xf32> to vector<8x32xf32>
    %100 = arith.addf %98, %99 : vector<8x32xf32>
    %c0_66 = arith.constant 0 : index
    %c0_67 = arith.constant 0 : index
    %101 = vector.load %arg22[%c0_66, %c0_67] : memref<8x32xf32, #tpu.memory_space<vmem>>, vector<8x32xf32>
    tpu.vector_store %arg22[%c0_66, %c0_67], %100 {strides = array<i32>} : memref<8x32xf32, #tpu.memory_space<vmem>>, vector<8x32xf32>,
    return
  }
  func.func @transform_0(%arg0: i32) -> (i32, i32) {
    %c0_i32 = arith.constant 0 : i32
    %c0_i32_0 = arith.constant 0 : i32
    return %arg0, %c0_i32 : i32, i32
  }
  func.func @transform_1(%arg0: i32) -> (i32, i32) {
    %c0_i32 = arith.constant 0 : i32
    %c0_i32_0 = arith.constant 0 : i32
    %c0_i32_1 = arith.constant 0 : i32
    return %c0_i32, %c0_i32_0 : i32, i32
  }
  func.func @transform_2(%arg0: i32) -> (i32, i32) {
    %c0_i32 = arith.constant 0 : i32
    %c0_i32_0 = arith.constant 0 : i32
    %c0_i32_1 = arith.constant 0 : i32
    return %c0_i32, %c0_i32_0 : i32, i32
  }
  func.func @transform_3(%arg0: i32) -> (i32, i32) {
    %c0_i32 = arith.constant 0 : i32
    %c0_i32_0 = arith.constant 0 : i32
    %c0_i32_1 = arith.constant 0 : i32
    return %c0_i32, %c0_i32_0 : i32, i32
  }
  func.func @transform_4(%arg0: i32) -> (i32, i32) {
    %c0_i32 = arith.constant 0 : i32
    %c0_i32_0 = arith.constant 0 : i32
    %c0_i32_1 = arith.constant 0 : i32
    return %c0_i32, %c0_i32_0 : i32, i32
  }
  func.func @transform_5(%arg0: i32) -> (i32, i32) {
    %c0_i32 = arith.constant 0 : i32
    %c0_i32_0 = arith.constant 0 : i32
    %c0_i32_1 = arith.constant 0 : i32
    return %c0_i32, %c0_i32_0 : i32, i32
  }
  func.func @transform_6(%arg0: i32) -> (i32, i32) {
    %c0_i32 = arith.constant 0 : i32
    %c0_i32_0 = arith.constant 0 : i32
    %c0_i32_1 = arith.constant 0 : i32
    return %c0_i32, %c0_i32_0 : i32, i32
  }
  func.func @transform_7(%arg0: i32) -> (i32, i32) {
    %c0_i32 = arith.constant 0 : i32
    %c0_i32_0 = arith.constant 0 : i32
    %c0_i32_1 = arith.constant 0 : i32
    return %c0_i32, %c0_i32_0 : i32, i32
  }
  func.func @transform_8(%arg0: i32) -> (i32, i32) {
    %c0_i32 = arith.constant 0 : i32
    %c0_i32_0 = arith.constant 0 : i32
    %c0_i32_1 = arith.constant 0 : i32
    return %c0_i32, %c0_i32_0 : i32, i32
  }
  func.func @transform_9(%arg0: i32) -> (i32, i32) {
    %c0_i32 = arith.constant 0 : i32
    %c0_i32_0 = arith.constant 0 : i32
    %c0_i32_1 = arith.constant 0 : i32
    return %c0_i32, %c0_i32_0 : i32, i32
  }
  func.func @transform_10(%arg0: i32) -> (i32, i32) {
    %c0_i32 = arith.constant 0 : i32
    %c0_i32_0 = arith.constant 0 : i32
    %c0_i32_1 = arith.constant 0 : i32
    return %c0_i32, %c0_i32_0 : i32, i32
  }
  func.func @transform_11(%arg0: i32) -> (i32, i32) {
    %c0_i32 = arith.constant 0 : i32
    %c0_i32_0 = arith.constant 0 : i32
    %c0_i32_1 = arith.constant 0 : i32
    return %c0_i32, %c0_i32_0 : i32, i32
  }
  func.func @transform_12(%arg0: i32) -> (i32, i32) {
    %c0_i32 = arith.constant 0 : i32
    %c0_i32_0 = arith.constant 0 : i32
    %c0_i32_1 = arith.constant 0 : i32
    return %c0_i32, %c0_i32_0 : i32, i32
  }
  func.func @transform_13(%arg0: i32) -> (i32, i32) {
    %c0_i32 = arith.constant 0 : i32
    %c0_i32_0 = arith.constant 0 : i32
    %c0_i32_1 = arith.constant 0 : i32
    return %c0_i32, %c0_i32_0 : i32, i32
  }
  func.func @transform_14(%arg0: i32) -> (i32, i32) {
    %c0_i32 = arith.constant 0 : i32
    %c0_i32_0 = arith.constant 0 : i32
    %c0_i32_1 = arith.constant 0 : i32
    return %c0_i32, %c0_i32_0 : i32, i32
  }
  func.func @transform_15(%arg0: i32) -> (i32, i32) {
    %c0_i32 = arith.constant 0 : i32
    %c0_i32_0 = arith.constant 0 : i32
    %c0_i32_1 = arith.constant 0 : i32
    return %c0_i32, %c0_i32_0 : i32, i32
  }
  func.func @transform_16(%arg0: i32) -> (i32, i32) {
    %c0_i32 = arith.constant 0 : i32
    %c0_i32_0 = arith.constant 0 : i32
    %c0_i32_1 = arith.constant 0 : i32
    return %c0_i32, %c0_i32_0 : i32, i32
  }
  func.func @transform_17(%arg0: i32) -> (i32, i32) {
    %c0_i32 = arith.constant 0 : i32
    %c0_i32_0 = arith.constant 0 : i32
    %c0_i32_1 = arith.constant 0 : i32
    return %c0_i32, %c0_i32_0 : i32, i32
  }
  func.func @transform_18(%arg0: i32) -> (i32, i32) {
    %c0_i32 = arith.constant 0 : i32
    %c0_i32_0 = arith.constant 0 : i32
    %c0_i32_1 = arith.constant 0 : i32
    return %c0_i32, %c0_i32_0 : i32, i32
  }
  func.func @transform_19(%arg0: i32) -> (i32, i32) {
    %c0_i32 = arith.constant 0 : i32
    %c0_i32_0 = arith.constant 0 : i32
    %c0_i32_1 = arith.constant 0 : i32
    return %c0_i32, %c0_i32_0 : i32, i32
  }
  func.func @transform_20(%arg0: i32) -> (i32, i32) {
    %c0_i32 = arith.constant 0 : i32
    %c0_i32_0 = arith.constant 0 : i32
    %c0_i32_1 = arith.constant 0 : i32
    return %c0_i32, %c0_i32_0 : i32, i32
  }
  func.func @transform_21(%arg0: i32) -> (i32, i32) {
    %c0_i32 = arith.constant 0 : i32
    %c0_i32_0 = arith.constant 0 : i32
    return %arg0, %c0_i32 : i32, i32
  }
}

</mosaic_0001>

<bundles_post_ra>
// kernel: autoencoder_forward.1
= control target key start
LH: loop header
LB: loop body
LE: loop exit
PB: predicated region body
PF: predicated region fallthrough
CT: control target
= control target key end

     0   :  { %s2770_s0 = inlined_call_operand.hbm [shape: f32[8,32], index: 0, kind: input, shape index: {}]   ;;  %s2771_s1 = inlined_call_operand.hbm [shape: bf16[32,128], index: 1, kind: input, shape index: {}]   ;;  %s2772_s2 = inlined_call_operand.hbm [shape: f32[1,128], index: 2, kind: input, shape index: {}]   ;;  %s2773_s3 = inlined_call_operand.vmem [shape: bf16[128,128], index: 3, kind: input, shape index: {}]   ;;  %s2774_s4 = inlined_call_operand.hbm [shape: f32[1,128], index: 4, kind: input, shape index: {}]   ;;  %s2775_s5 = inlined_call_operand.hbm [shape: bf16[128,128], index: 5, kind: input, shape index: {}]   ;;  %s2776_s6 = inlined_call_operand.hbm [shape: f32[1,128], index: 6, kind: input, shape index: {}]   ;;  %s2777_s7 = inlined_call_operand.hbm [shape: bf16[128,128], index: 7, kind: input, shape index: {}]   ;;  %s2778_s8 = inlined_call_operand.hbm [shape: f32[1,128], index: 8, kind: input, shape index: {}]   ;;  %s2779_s9 = inlined_call_operand.hbm [shape: bf16[128,128], index: 9, kind: input, shape index: {}]   ;;  %s2780_s10 = inlined_call_operand.hbm [shape: f32[1,128], index: 10, kind: input, shape index: {}]   ;;  %s2781_s11 = inlined_call_operand.hbm [shape: bf16[128,128], index: 11, kind: input, shape index: {}]   ;;  %s2782_s12 = inlined_call_operand.hbm [shape: f32[1,128], index: 12, kind: input, shape index: {}]   ;;  %s2783_s13 = inlined_call_operand.vmem [shape: bf16[128,128], index: 13, kind: input, shape index: {}]   ;;  %s2784_s14 = inlined_call_operand.hbm [shape: f32[1,128], index: 14, kind: input, shape index: {}]   ;;  %s2785_s15 = inlined_call_operand.hbm [shape: bf16[128,128], index: 15, kind: input, shape index: {}]   ;;  %s2786_s16 = inlined_call_operand.hbm [shape: f32[1,128], index: 16, kind: input, shape index: {}]   ;;  %s2787_s17 = inlined_call_operand.hbm [shape: bf16[128,128], index: 17, kind: input, shape index: {}]   ;;  %s2788_s18 = inlined_call_operand.vmem [shape: f32[1,128], index: 18, kind: input, shape index: {}]   ;;  %s2789_s19 = inlined_call_operand.vmem [shape: bf16[128,32], index: 19, kind: input, shape index: {}]   ;;  %s2790_s20 = inlined_call_operand.vmem [shape: f32[1,32], index: 20, kind: input, shape index: {}]   ;;  %s2791_s21 = inlined_call_operand.hbm [shape: f32[8,32], index: 21, kind: output, shape index: {}]  }
   0x1   :  { %2799 = sst [smem:[#allocation39_spill]] %s2770_s0 }
   0x2   :  { %2800 = sst [smem:[#allocation40_spill]] %s2771_s1 }
   0x3   :  { %2801 = sst [smem:[#allocation41_spill]] %s2772_s2 }
   0x4   :  { %2802 = sst [smem:[#allocation42_spill]] %s2773_s3 }
   0x5   :  { %2803 = sst [smem:[#allocation43_spill]] %s2774_s4 }
   0x6   :  { %2804 = sst [smem:[#allocation44_spill]] %s2775_s5 }
   0x7   :  { %2805 = sst [smem:[#allocation45_spill]] %s2788_s18 }
   0x8   :  { %2806 = sst [smem:[#allocation46_spill]] %s2790_s20 }
   0x9   :  { %2807 = sst [smem:[#allocation47_spill]] %s2791_s21 }
   0xa   :  { %26 = vsyncpa [#allocation3], 0 }
   0xb   :  { %27 = vsyncpa [#allocation6], 0 }
   0xc   :  { %28 = vsyncpa [#allocation9], 0 }
   0xd   :  { %29 = vsyncpa [#allocation12], 0 }
   0xe   :  { %30 = vsyncpa [#allocation15], 0 }
   0xf   :  { %31 = vsyncpa [#allocation18], 0 }
  0x10   :  { %32 = vsyncpa [#allocation21], 0 }
  0x11   :  { %33 = vsyncpa [#allocation24], 0 }
  0x12   :  { %34 = vsyncpa [#allocation27], 0 }
  0x13   :  { %35 = vsyncpa [#allocation4], 0  ;;  %s2240_s2 = smov [#allocation5]   ;;  %s2808_s3 = sld [smem:[#allocation40_spill]] }
  0x14   :  { %s51_s25 = sshll.u32 %s2240_s2, 4  ;;  %s52_s25 = int_to_ptr.vmem [resolvable:$true] %s51_s25 }
  0x19   :  { %s1846_s28 = scalar_lea.hbm %s2808_s3, 256 }
  0x1a   :  { %p1847_p0 = scmp.ne.s32.totalorder %s2808_s3, %s1846_s28  ;;  %p1850_p1 = scmp.lt.u32.totalorder %s1846_s28, %s2808_s3 }
  0x1c   :  { %p1852_p2 = pnand %p1850_p1, %p1847_p0 }
  0x1e   :  { %1855 = shalt.err (!%p1852_p2)
}
  0x1f   :  { %s1856_s5 = scalar_lea.vmem %s52_s25, 256  ;;  %p1861_p4 = scmp.lt.s32.totalorder %s52_s25, %s52_s25 }
  0x20   :  { %p1857_p3 = scmp.ne.s32.totalorder %s52_s25, %s1856_s5  ;;  %p1862_p5 = scmp.lt.s32.totalorder %s1856_s5, %s1856_s5 }
  0x22   :  { %p1863_p6 = por %p1862_p5, %p1861_p4 }
  0x24   :  { %p1864_p7 = pnand %p1863_p6, %p1857_p3 }
  0x26   :  { %1867 = shalt.err (!%p1864_p7)
}
  0x27   :  { %s2241_s22 = smov 64   ;;  %s2242_s23 = smov 4  }
  0x28   :  { %57 = dma.hbm_to_vmem [thread:$0]  %s2808_s3, 256, %s52_s25, [#allocation6], %s2241_s22, %s2241_s22, %s2242_s23  }
  0x29   :  { %s2243_s2 = smov [#allocation8]   ;;  %s2244_s27 = smov [#allocation11]  }
  0x2a   :  { %s76_s26 = sshll.u32 %s2243_s2, 4  ;;  %s98_s28 = sshll.u32 %s2244_s27, 4  ;;  %s77_s26 = int_to_ptr.vmem [resolvable:$true] %s76_s26  ;;  %s99_s28 = int_to_ptr.vmem [resolvable:$true] %s98_s28 }
  0x2b   :  { %s2809_s4 = sld [smem:[#allocation43_spill]] }
  0x31   :  { %s1868_s30 = scalar_lea.hbm %s2809_s4, 16 }
  0x32   :  { %p1869_p8 = scmp.ne.s32.totalorder %s2809_s4, %s1868_s30  ;;  %p1872_p9 = scmp.lt.u32.totalorder %s1868_s30, %s2809_s4 }
  0x34   :  { %p1874_p10 = pnand %p1872_p9, %p1869_p8 }
  0x36   :  { %1877 = shalt.err (!%p1874_p10)
}
  0x37   :  { %s1878_s25 = scalar_lea.vmem %s77_s26, 16  ;;  %s1882_s3 = scalar_lea.vmem %s77_s26, 32 }
  0x38   :  { %p1879_p11 = scmp.ne.s32.totalorder %s77_s26, %s1878_s25  ;;  %p1883_p12 = scmp.lt.s32.totalorder %s77_s26, %s77_s26 }
  0x39   :  { %p1884_p13 = scmp.lt.s32.totalorder %s1882_s3, %s1878_s25 }
  0x3b   :  { %p1885_p0 = por %p1884_p13, %p1883_p12 }
  0x3d   :  { %p1886_p1 = pnand %p1885_p0, %p1879_p11 }
  0x3f   :  { %1889 = shalt.err (!%p1886_p1)
}
  0x40   :  { %79 = dma.hbm_to_vmem [thread:$0]  %s2809_s4, 16, %s77_s26, [#allocation9]  }
  0x41   :  { %s1890_s18 = scalar_lea.hbm %s2776_s6, 16 }
  0x42   :  { %p1891_p2 = scmp.ne.s32.totalorder %s2776_s6, %s1890_s18  ;;  %p1894_p3 = scmp.lt.u32.totalorder %s1890_s18, %s2776_s6 }
  0x44   :  { %p1896_p4 = pnand %p1894_p3, %p1891_p2 }
  0x46   :  { %1899 = shalt.err (!%p1896_p4)
}
  0x47   :  { %s1900_s30 = scalar_lea.vmem %s99_s28, 16  ;;  %s1904_s5 = scalar_lea.vmem %s99_s28, 32 }
  0x48   :  { %p1901_p5 = scmp.ne.s32.totalorder %s99_s28, %s1900_s30  ;;  %p1905_p6 = scmp.lt.s32.totalorder %s99_s28, %s99_s28 }
  0x49   :  { %p1906_p7 = scmp.lt.s32.totalorder %s1904_s5, %s1900_s30 }
  0x4b   :  { %p1907_p8 = por %p1906_p7, %p1905_p6 }
  0x4d   :  { %p1908_p9 = pnand %p1907_p8, %p1901_p5 }
  0x4f   :  { %1911 = shalt.err (!%p1908_p9)
}
  0x50   :  { %101 = dma.hbm_to_vmem [thread:$0]  %s2776_s6, 16, %s99_s28, [#allocation12]  }
  0x51   :  { %s2245_s25 = smov [#allocation14]   ;;  %s2246_s1 = smov [#allocation17]  }
  0x52   :  { %s120_s3 = sshll.u32 %s2245_s25, 4  ;;  %s142_s24 = sshll.u32 %s2246_s1, 4  ;;  %s121_s3 = int_to_ptr.vmem [resolvable:$true] %s120_s3  ;;  %s143_s24 = int_to_ptr.vmem [resolvable:$true] %s142_s24 }
  0x53   :  { %s1912_s18 = scalar_lea.hbm %s2778_s8, 16 }
  0x54   :  { %p1913_p10 = scmp.ne.s32.totalorder %s2778_s8, %s1912_s18  ;;  %p1916_p11 = scmp.lt.u32.totalorder %s1912_s18, %s2778_s8 }
  0x56   :  { %p1918_p12 = pnand %p1916_p11, %p1913_p10 }
  0x58   :  { %1921 = shalt.err (!%p1918_p12)
}
  0x59   :  { %s1922_s6 = scalar_lea.vmem %s121_s3, 16  ;;  %s1926_s28 = scalar_lea.vmem %s121_s3, 32 }
  0x5a   :  { %p1923_p13 = scmp.ne.s32.totalorder %s121_s3, %s1922_s6  ;;  %p1927_p0 = scmp.lt.s32.totalorder %s121_s3, %s121_s3 }
  0x5b   :  { %p1928_p1 = scmp.lt.s32.totalorder %s1926_s28, %s1922_s6 }
  0x5d   :  { %p1929_p2 = por %p1928_p1, %p1927_p0 }
  0x5f   :  { %p1930_p3 = pnand %p1929_p2, %p1923_p13 }
  0x61   :  { %1933 = shalt.err (!%p1930_p3)
}
  0x62   :  { %123 = dma.hbm_to_vmem [thread:$0]  %s2778_s8, 16, %s121_s3, [#allocation15]  }
  0x63   :  { %s1934_s25 = scalar_lea.hbm %s2780_s10, 16 }
  0x64   :  { %p1935_p4 = scmp.ne.s32.totalorder %s2780_s10, %s1934_s25  ;;  %p1938_p5 = scmp.lt.u32.totalorder %s1934_s25, %s2780_s10 }
  0x66   :  { %p1940_p6 = pnand %p1938_p5, %p1935_p4 }
  0x68   :  { %1943 = shalt.err (!%p1940_p6)
}
  0x69   :  { %s1944_s20 = scalar_lea.vmem %s143_s24, 16  ;;  %s1948_s27 = scalar_lea.vmem %s143_s24, 32 }
  0x6a   :  { %p1945_p7 = scmp.ne.s32.totalorder %s143_s24, %s1944_s20  ;;  %p1949_p8 = scmp.lt.s32.totalorder %s143_s24, %s143_s24 }
  0x6b   :  { %p1950_p9 = scmp.lt.s32.totalorder %s1948_s27, %s1944_s20 }
  0x6d   :  { %p1951_p10 = por %p1950_p9, %p1949_p8 }
  0x6f   :  { %p1952_p11 = pnand %p1951_p10, %p1945_p7 }
  0x71   :  { %1955 = shalt.err (!%p1952_p11)
}
  0x72   :  { %145 = dma.hbm_to_vmem [thread:$0]  %s2780_s10, 16, %s143_s24, [#allocation18]  }
  0x73   :  { %s2247_s29 = smov [#allocation20]   ;;  %s2248_s6 = smov [#allocation23]  }
  0x74   :  { %s164_s0 = sshll.u32 %s2247_s29, 4  ;;  %s185_s28 = sshll.u32 %s2248_s6, 4  ;;  %s165_s0 = int_to_ptr.vmem [resolvable:$true] %s164_s0  ;;  %s186_s28 = int_to_ptr.vmem [resolvable:$true] %s185_s28 }
  0x75   :  { %s1956_s26 = scalar_lea.hbm %s2782_s12, 16 }
  0x76   :  { %p1957_p12 = scmp.ne.s32.totalorder %s2782_s12, %s1956_s26  ;;  %p1960_p13 = scmp.lt.u32.totalorder %s1956_s26, %s2782_s12 }
  0x78   :  { %p1962_p0 = pnand %p1960_p13, %p1957_p12 }
  0x7a   :  { %1965 = shalt.err (!%p1962_p0)
}
  0x7b   :  { %s1966_s10 = scalar_lea.vmem %s165_s0, 16  ;;  %s1970_s24 = scalar_lea.vmem %s165_s0, 32 }
  0x7c   :  { %p1967_p1 = scmp.ne.s32.totalorder %s165_s0, %s1966_s10  ;;  %p1971_p2 = scmp.lt.s32.totalorder %s165_s0, %s165_s0 }
  0x7d   :  { %p1972_p3 = scmp.lt.s32.totalorder %s1970_s24, %s1966_s10 }
  0x7f   :  { %p1973_p4 = por %p1972_p3, %p1971_p2 }
  0x81   :  { %p1974_p5 = pnand %p1973_p4, %p1967_p1 }
  0x83   :  { %1977 = shalt.err (!%p1974_p5)
}
  0x84   :  { %167 = dma.hbm_to_vmem [thread:$0]  %s2782_s12, 16, %s165_s0, [#allocation21]  }
  0x85   :  { %s1978_s8 = scalar_lea.hbm %s2785_s15, 1024 }
  0x86   :  { %p1979_p6 = scmp.ne.s32.totalorder %s2785_s15, %s1978_s8  ;;  %p1982_p7 = scmp.lt.u32.totalorder %s1978_s8, %s2785_s15 }
  0x88   :  { %p1984_p8 = pnand %p1982_p7, %p1979_p6 }
  0x8a   :  { %1987 = shalt.err (!%p1984_p8)
}
  0x8b   :  { %s1988_s5 = scalar_lea.vmem %s186_s28, 1024  ;;  %p1993_p10 = scmp.lt.s32.totalorder %s186_s28, %s186_s28 }
  0x8c   :  { %p1989_p9 = scmp.ne.s32.totalorder %s186_s28, %s1988_s5  ;;  %p1994_p11 = scmp.lt.s32.totalorder %s1988_s5, %s1988_s5 }
  0x8e   :  { %p1995_p12 = por %p1994_p11, %p1993_p10 }
  0x90   :  { %p1996_p13 = pnand %p1995_p12, %p1989_p9 }
  0x92   :  { %1999 = shalt.err (!%p1996_p13)
}
  0x93   :  { %191 = dma.hbm_to_vmem [thread:$0]  %s2785_s15, 1024, %s186_s28, [#allocation24], %s2241_s22, %s2241_s22, %s2242_s23  }
  0x94   :  { %s2249_s26 = smov [#allocation2]   ;;  %s2250_s25 = smov [#allocation7]  }
  0x95   :  { %s42_s4 = sshll.u32 %s2249_s26, 4  ;;  %s64_s1 = sshll.u32 %s2250_s25, 4  ;;  %s43_s4 = int_to_ptr.vmem [resolvable:$true] %s42_s4  ;;  %s65_s1 = int_to_ptr.vmem [resolvable:$true] %s64_s1 }
  0x96   :  { %s2810_s24 = sld [smem:[#allocation39_spill]] }
  0x9c   :  { %s2000_s2 = scalar_lea.hbm %s2810_s24, 128 }
  0x9d   :  { %p2001_p0 = scmp.ne.s32.totalorder %s2810_s24, %s2000_s2  ;;  %p2004_p1 = scmp.lt.u32.totalorder %s2000_s2, %s2810_s24 }
  0x9f   :  { %p2006_p2 = pnand %p2004_p1, %p2001_p0 }
  0xa1   :  { %2009 = shalt.err (!%p2006_p2)
}
  0xa2   :  { %s2010_s15 = scalar_lea.vmem %s43_s4, 128  ;;  %p2015_p4 = scmp.lt.s32.totalorder %s43_s4, %s43_s4 }
  0xa3   :  { %p2011_p3 = scmp.ne.s32.totalorder %s43_s4, %s2010_s15  ;;  %p2016_p5 = scmp.lt.s32.totalorder %s2010_s15, %s2010_s15 }
  0xa5   :  { %p2017_p6 = por %p2016_p5, %p2015_p4 }
  0xa7   :  { %p2018_p7 = pnand %p2017_p6, %p2011_p3 }
  0xa9   :  { %2021 = shalt.err (!%p2018_p7)
}
  0xaa   :  { %45 = dma.hbm_to_vmem [thread:$0]  %s2810_s24, 128, %s43_s4, [#allocation3]  }
  0xab   :  { %s2811_s30 = sld [smem:[#allocation41_spill]] }
  0xb1   :  { %s2022_s5 = scalar_lea.hbm %s2811_s30, 16 }
  0xb2   :  { %p2023_p8 = scmp.ne.s32.totalorder %s2811_s30, %s2022_s5  ;;  %p2026_p9 = scmp.lt.u32.totalorder %s2022_s5, %s2811_s30 }
  0xb4   :  { %p2028_p10 = pnand %p2026_p9, %p2023_p8 }
  0xb6   :  { %2031 = shalt.err (!%p2028_p10)
}
  0xb7   :  { %s2032_s21 = scalar_lea.vmem %s65_s1, 16  ;;  %s2036_s10 = scalar_lea.vmem %s65_s1, 32 }
  0xb8   :  { %p2033_p11 = scmp.ne.s32.totalorder %s65_s1, %s2032_s21  ;;  %p2037_p12 = scmp.lt.s32.totalorder %s65_s1, %s65_s1 }
  0xb9   :  { %p2038_p13 = scmp.lt.s32.totalorder %s2036_s10, %s2032_s21 }
  0xbb   :  { %p2039_p0 = por %p2038_p13, %p2037_p12 }
  0xbd   :  { %p2040_p1 = pnand %p2039_p0, %p2033_p11 }
  0xbf   :  { %2043 = shalt.err (!%p2040_p1)
}
  0xc0   :  { %67 = dma.hbm_to_vmem [thread:$0]  %s2811_s30, 16, %s65_s1, [#allocation6]  }
  0xc1   :  { %s2251_s2 = smov [#allocation10]   ;;  %s2252_s20 = smov [#allocation13]  }
  0xc2   :  { %s85_s18 = sshll.u32 %s2251_s2, 4  ;;  %s107_s27 = sshll.u32 %s2252_s20, 4  ;;  %s86_s18 = int_to_ptr.vmem [resolvable:$true] %s85_s18  ;;  %s108_s27 = int_to_ptr.vmem [resolvable:$true] %s107_s27 }
  0xc3   :  { %s2812_s28 = sld [smem:[#allocation44_spill]] }
  0xc9   :  { %s2044_s3 = scalar_lea.hbm %s2812_s28, 1024 }
  0xca   :  { %p2045_p2 = scmp.ne.s32.totalorder %s2812_s28, %s2044_s3  ;;  %p2048_p3 = scmp.lt.u32.totalorder %s2044_s3, %s2812_s28 }
  0xcc   :  { %p2050_p4 = pnand %p2048_p3, %p2045_p2 }
  0xce   :  { %2053 = shalt.err (!%p2050_p4)
}
  0xcf   :  { %s2054_s1 = scalar_lea.vmem %s86_s18, 1024  ;;  %p2059_p6 = scmp.lt.s32.totalorder %s86_s18, %s86_s18 }
  0xd0   :  { %p2055_p5 = scmp.ne.s32.totalorder %s86_s18, %s2054_s1  ;;  %p2060_p7 = scmp.lt.s32.totalorder %s2054_s1, %s2054_s1 }
  0xd2   :  { %p2061_p8 = por %p2060_p7, %p2059_p6 }
  0xd4   :  { %p2062_p9 = pnand %p2061_p8, %p2055_p5 }
  0xd6   :  { %2065 = shalt.err (!%p2062_p9)
}
  0xd7   :  { %91 = dma.hbm_to_vmem [thread:$0]  %s2812_s28, 1024, %s86_s18, [#allocation9], %s2241_s22, %s2241_s22, %s2242_s23  }
  0xd8   :  { %s2066_s21 = scalar_lea.hbm %s2777_s7, 1024 }
  0xd9   :  { %p2067_p10 = scmp.ne.s32.totalorder %s2777_s7, %s2066_s21  ;;  %p2070_p11 = scmp.lt.u32.totalorder %s2066_s21, %s2777_s7 }
  0xdb   :  { %p2072_p12 = pnand %p2070_p11, %p2067_p10 }
  0xdd   :  { %2075 = shalt.err (!%p2072_p12)
}
  0xde   :  { %s2076_s20 = scalar_lea.vmem %s108_s27, 1024  ;;  %p2081_p0 = scmp.lt.s32.totalorder %s108_s27, %s108_s27 }
  0xdf   :  { %p2077_p13 = scmp.ne.s32.totalorder %s108_s27, %s2076_s20  ;;  %p2082_p1 = scmp.lt.s32.totalorder %s2076_s20, %s2076_s20 }
  0xe1   :  { %p2083_p2 = por %p2082_p1, %p2081_p0 }
  0xe3   :  { %p2084_p3 = pnand %p2083_p2, %p2077_p13 }
  0xe5   :  { %2087 = shalt.err (!%p2084_p3)
}
  0xe6   :  { %113 = dma.hbm_to_vmem [thread:$0]  %s2777_s7, 1024, %s108_s27, [#allocation12], %s2241_s22, %s2241_s22, %s2242_s23  }
  0xe7   :  { %s2253_s15 = smov [#allocation16]   ;;  %s2254_s3 = smov [#allocation19]  }
  0xe8   :  { %s129_s28 = sshll.u32 %s2253_s15, 4  ;;  %s151_s29 = sshll.u32 %s2254_s3, 4  ;;  %s130_s28 = int_to_ptr.vmem [resolvable:$true] %s129_s28  ;;  %s152_s29 = int_to_ptr.vmem [resolvable:$true] %s151_s29 }
  0xe9   :  { %s2088_s12 = scalar_lea.hbm %s2779_s9, 1024 }
  0xea   :  { %p2089_p4 = scmp.ne.s32.totalorder %s2779_s9, %s2088_s12  ;;  %p2092_p5 = scmp.lt.u32.totalorder %s2088_s12, %s2779_s9 }
  0xec   :  { %p2094_p6 = pnand %p2092_p5, %p2089_p4 }
  0xee   :  { %2097 = shalt.err (!%p2094_p6)
}
  0xef   :  { %s2098_s7 = scalar_lea.vmem %s130_s28, 1024  ;;  %p2103_p8 = scmp.lt.s32.totalorder %s130_s28, %s130_s28 }
  0xf0   :  { %p2099_p7 = scmp.ne.s32.totalorder %s130_s28, %s2098_s7  ;;  %p2104_p9 = scmp.lt.s32.totalorder %s2098_s7, %s2098_s7 }
  0xf2   :  { %p2105_p10 = por %p2104_p9, %p2103_p8 }
  0xf4   :  { %p2106_p11 = pnand %p2105_p10, %p2099_p7 }
  0xf6   :  { %2109 = shalt.err (!%p2106_p11)
}
  0xf7   :  { %135 = dma.hbm_to_vmem [thread:$0]  %s2779_s9, 1024, %s130_s28, [#allocation15], %s2241_s22, %s2241_s22, %s2242_s23  }
  0xf8   :  { %s2110_s4 = scalar_lea.hbm %s2781_s11, 1024 }
  0xf9   :  { %p2111_p12 = scmp.ne.s32.totalorder %s2781_s11, %s2110_s4  ;;  %p2114_p13 = scmp.lt.u32.totalorder %s2110_s4, %s2781_s11 }
  0xfb   :  { %p2116_p0 = pnand %p2114_p13, %p2111_p12 }
  0xfd   :  { %2119 = shalt.err (!%p2116_p0)
}
  0xfe   :  { %s2120_s8 = scalar_lea.vmem %s152_s29, 1024  ;;  %p2125_p2 = scmp.lt.s32.totalorder %s152_s29, %s152_s29 }
  0xff   :  { %p2121_p1 = scmp.ne.s32.totalorder %s152_s29, %s2120_s8  ;;  %p2126_p3 = scmp.lt.s32.totalorder %s2120_s8, %s2120_s8 }
 0x101   :  { %p2127_p4 = por %p2126_p3, %p2125_p2 }
 0x103   :  { %p2128_p5 = pnand %p2127_p4, %p2121_p1 }
 0x105   :  { %2131 = shalt.err (!%p2128_p5)
}
 0x106   :  { %157 = dma.hbm_to_vmem [thread:$0]  %s2781_s11, 1024, %s152_s29, [#allocation18], %s2241_s22, %s2241_s22, %s2242_s23  }
 0x107   :  { %s2255_s28 = smov [#allocation22]   ;;  %s2256_s6 = smov [#allocation25]  }
 0x108   :  { %s176_s3 = sshll.u32 %s2255_s28, 4  ;;  %s198_s5 = sshll.u32 %s2256_s6, 4  ;;  %s177_s3 = int_to_ptr.vmem [resolvable:$true] %s176_s3  ;;  %s199_s5 = int_to_ptr.vmem [resolvable:$true] %s198_s5 }
 0x109   :  { %s2132_s30 = scalar_lea.hbm %s2784_s14, 16 }
 0x10a   :  { %p2133_p6 = scmp.ne.s32.totalorder %s2784_s14, %s2132_s30  ;;  %p2136_p7 = scmp.lt.u32.totalorder %s2132_s30, %s2784_s14 }
 0x10c   :  { %p2138_p8 = pnand %p2136_p7, %p2133_p6 }
 0x10e   :  { %2141 = shalt.err (!%p2138_p8)
}
 0x10f   :  { %s2142_s11 = scalar_lea.vmem %s177_s3, 16  ;;  %s2146_s29 = scalar_lea.vmem %s177_s3, 32 }
 0x110   :  { %p2143_p9 = scmp.ne.s32.totalorder %s177_s3, %s2142_s11  ;;  %p2147_p10 = scmp.lt.s32.totalorder %s177_s3, %s177_s3 }
 0x111   :  { %p2148_p11 = scmp.lt.s32.totalorder %s2146_s29, %s2142_s11 }
 0x113   :  { %p2149_p12 = por %p2148_p11, %p2147_p10 }
 0x115   :  { %p2150_p13 = pnand %p2149_p12, %p2143_p9 }
 0x117   :  { %2153 = shalt.err (!%p2150_p13)
}
 0x118   :  { %179 = dma.hbm_to_vmem [thread:$0]  %s2784_s14, 16, %s177_s3, [#allocation21]  }
 0x119   :  { %s2154_s24 = scalar_lea.hbm %s2786_s16, 16 }
 0x11a   :  { %p2155_p0 = scmp.ne.s32.totalorder %s2786_s16, %s2154_s24  ;;  %p2158_p1 = scmp.lt.u32.totalorder %s2154_s24, %s2786_s16 }
 0x11c   :  { %p2160_p2 = pnand %p2158_p1, %p2155_p0 }
 0x11e   :  { %2163 = shalt.err (!%p2160_p2)
}
 0x11f   :  { %s2164_s9 = scalar_lea.vmem %s199_s5, 16  ;;  %s2168_s15 = scalar_lea.vmem %s199_s5, 32 }
 0x120   :  { %p2165_p3 = scmp.ne.s32.totalorder %s199_s5, %s2164_s9  ;;  %p2169_p4 = scmp.lt.s32.totalorder %s199_s5, %s199_s5 }
 0x121   :  { %p2170_p5 = scmp.lt.s32.totalorder %s2168_s15, %s2164_s9 }
 0x123   :  { %p2171_p6 = por %p2170_p5, %p2169_p4 }
 0x125   :  { %p2172_p7 = pnand %p2171_p6, %p2165_p3 }
 0x127   :  { %2175 = shalt.err (!%p2172_p7)
}
 0x128   :  { %201 = dma.hbm_to_vmem [thread:$0]  %s2786_s16, 16, %s199_s5, [#allocation24]  }
 0x129   :  { %s2257_s3 = smov [#allocation26]   ;;  %s2176_s30 = scalar_lea.hbm %s2787_s17, 1024 }
 0x12a   :  { %s207_s6 = sshll.u32 %s2257_s3, 4  ;;  %p2177_p8 = scmp.ne.s32.totalorder %s2787_s17, %s2176_s30  ;;  %s208_s6 = int_to_ptr.vmem [resolvable:$true] %s207_s6 }
 0x12b   :  { %p2180_p9 = scmp.lt.u32.totalorder %s2176_s30, %s2787_s17 }
 0x12d   :  { %p2182_p10 = pnand %p2180_p9, %p2177_p8 }
 0x12f   :  { %2185 = shalt.err (!%p2182_p10)
}
 0x130   :  { %s2186_s11 = scalar_lea.vmem %s208_s6, 1024  ;;  %p2191_p12 = scmp.lt.s32.totalorder %s208_s6, %s208_s6 }
 0x131   :  { %p2187_p11 = scmp.ne.s32.totalorder %s208_s6, %s2186_s11  ;;  %p2192_p13 = scmp.lt.s32.totalorder %s2186_s11, %s2186_s11 }
 0x133   :  { %p2193_p0 = por %p2192_p13, %p2191_p12 }
 0x135   :  { %p2194_p1 = pnand %p2193_p0, %p2187_p11 }
 0x137   :  { %2197 = shalt.err (!%p2194_p1)
}
 0x138   :  { %213 = dma.hbm_to_vmem [thread:$0]  %s2787_s17, 1024, %s208_s6, [#allocation27], %s2241_s22, %s2241_s22, %s2242_s23  }
 0x139   :  { %2220 = dma.done.wait [#allocation3], 128  }
 0x13a   :  { %2221 = vsyncadd [#allocation3], 4294967168 }
 0x13b   :  { %2222 = dma.done.wait [#allocation6], 272  }
 0x13c   :  { %2223 = vsyncadd [#allocation6], 4294967024 }
 0x13d   :  { %2224 = dma.done.wait [#allocation9], 1040  }
 0x13e   :  { %2225 = vsyncadd [#allocation9], 4294966256 }
 0x13f   :  { %2226 = dma.done.wait [#allocation12], 1040  }
 0x140   :  { %2227 = vsyncadd [#allocation12], 4294966256 }
 0x141   :  { %2228 = dma.done.wait [#allocation15], 1040  }
 0x142   :  { %2229 = vsyncadd [#allocation15], 4294966256 }
 0x143   :  { %2230 = dma.done.wait [#allocation18], 1040  }
 0x144   :  { %2231 = vsyncadd [#allocation18], 4294966256 }
 0x145   :  { %2232 = dma.done.wait [#allocation21], 32  }
 0x146   :  { %2233 = vsyncadd [#allocation21], 4294967264 }
 0x147   :  { %2234 = dma.done.wait [#allocation24], 1040  }
 0x148   :  { %2235 = vsyncadd [#allocation24], 4294966256 }
 0x149   :  { %2236 = dma.done.wait [#allocation27], 1024  }
 0x14a   :  { %2237 = vsyncadd [#allocation27], 4294966272  ;;  %v2258_v0 = vmov 0.0   ;;  %vm2259_vm0 = vmmov 0   ;;  %v1772_v1 = vld [vmem:[#allocation5] sm:$0xff]   ;;  %v1773_v2 = vld [vmem:[#allocation5 + $0x8] sm:$0xff]  }
 0x14b   :  { %1563 = vmatprep.subr.bf16.mxu0 %v2258_v0  ;;  %1567 = vmatprep.mubr.msk.bf16.mxu0 %vm2259_vm0, %v2258_v0  ;;  %v269_v3 = vld [vmem:[#allocation2] sm:$0xff]  ;;  %s2813_s23 = sld [smem:[#allocation42_spill]]  ;;  %vm294_vm1 = vcmask 261120   ;;  %v1784_v15 = vld [vmem:[#allocation10 + $0x10] sm:$0xff]   ;;  %v1785_v16 = vld [vmem:[#allocation10 + $0x18] sm:$0xff]   ;;  %s2814_s30 = sld [smem:[#allocation45_spill]] }
 0x14c   :  { %1571 = vmatprep.subr.bf16.mxu1 %v2258_v0  ;;  %1587 = vmatprep.mubr.msk.bf16.mxu1 %vm2259_vm0, %v2258_v0  ;;  %v275_v5 = vpack.c.bf16 %v269_v3, %v269_v3  ;;  %v1782_v13 = vld [vmem:[#allocation10] sm:$0xff]   ;;  %v1783_v14 = vld [vmem:[#allocation10 + $0x8] sm:$0xff]   ;;  %v1394_v19 = vld [vmem:[#allocation7] ss:$0 sm:$0xff]  ;;  %s2815_s7 = sld [smem:[#allocation46_spill]] }
 0x14d   :  { %1564 = vmatpush3.bf16.msra.mxu0 %v1772_v1  ;;  %v1786_v17 = vld [vmem:[#allocation10 + $0x20] sm:$0xff]   ;;  %v1787_v18 = vld [vmem:[#allocation10 + $0x28] sm:$0xff]   ;;  %v1788_v28 = vld [vmem:[#allocation10 + $0x30] sm:$0xff]  }
 0x14e   :  { %1565 = vmatprep.subr.bf16.mxu0 %v2258_v0  ;;  %v1789_v29 = vld [vmem:[#allocation10 + $0x38] sm:$0xff]   ;;  %v1790_v30 = vld [vmem:[#allocation13] sm:$0xff]   ;;  %v1791_v31 = vld [vmem:[#allocation13 + $0x8] sm:$0xff]  }
 0x14f   :  { %v1792_v32 = vld [vmem:[#allocation13 + $0x10] sm:$0xff]   ;;  %v1793_v33 = vld [vmem:[#allocation13 + $0x18] sm:$0xff]   ;;  %v1794_v34 = vld [vmem:[#allocation13 + $0x20] sm:$0xff]  }
 0x150   :  { %v1795_v35 = vld [vmem:[#allocation13 + $0x28] sm:$0xff]   ;;  %v1398_v36 = vld [vmem:[#allocation8] ss:$0 sm:$0xff]  ;;  %v1796_v45 = vld [vmem:[#allocation13 + $0x30] sm:$0xff]  }
 0x151   :  { %v1774_v4 = vld [vmem:[%s2813_s23] sm:$0xff]   ;;  %v1775_v6 = vld [vmem:[%s2813_s23 + $0x8] sm:$0xff]   ;;  %1566 = vmatpush3.bf16.msra.mxu0 %v1773_v2  ;;  %v1776_v7 = vld [vmem:[%s2813_s23 + $0x10] sm:$0xff]  }
 0x152   :  { %1572 = vmatpush3.bf16.msra.mxu1 %v1774_v4  ;;  %1591 = vmatprep.subr.bf16.mxu0 %v2258_v0  ;;  %v1777_v8 = vld [vmem:[%s2813_s23 + $0x18] sm:$0xff]   ;;  %v1778_v9 = vld [vmem:[%s2813_s23 + $0x20] sm:$0xff]   ;;  %v1779_v10 = vld [vmem:[%s2813_s23 + $0x28] sm:$0xff]  }
 0x153   :  { %1573 = vmatprep.subr.bf16.mxu1 %v2258_v0  ;;  %v1780_v11 = vld [vmem:[%s2813_s23 + $0x30] sm:$0xff]   ;;  %v1781_v12 = vld [vmem:[%s2813_s23 + $0x38] sm:$0xff]   ;;  %v1798_v47 = vld [vmem:[#allocation16] sm:$0xff]  }
 0x154   :  { %1568 = vmatmul.mubr.msk.bf16.vlgmr.msra.gmra.mrb[0].mxu0 %vm294_vm1, %v275_v5  ;;  %v1797_v46 = vld [vmem:[#allocation13 + $0x38] sm:$0xff]   ;;  %v1799_v48 = vld [vmem:[#allocation16 + $0x8] sm:$0xff]   ;;  %v1802_v51 = vld [vmem:[#allocation16 + $0x20] sm:$0xff]  }
 0x155   :  { %1607 = vmatprep.mubr.msk.bf16.mxu0 %vm2259_vm0, %v2258_v0  ;;  %1592 = vmatpush3.bf16.msra.mxu0 %v1782_v13  ;;  %v1800_v49 = vld [vmem:[#allocation16 + $0x10] sm:$0xff]   ;;  %v1801_v50 = vld [vmem:[#allocation16 + $0x18] sm:$0xff]   ;;  %v1803_v52 = vld [vmem:[#allocation16 + $0x28] sm:$0xff]  }
 0x156   :  { %1574 = vmatpush3.bf16.msra.mxu1 %v1775_v6  ;;  %1593 = vmatprep.subr.bf16.mxu0 %v2258_v0  ;;  %v1407_v53 = vld [vmem:[#allocation11] ss:$0 sm:$0xff]  ;;  %v1804_v62 = vld [vmem:[#allocation16 + $0x30] sm:$0xff]   ;;  %v1806_v1 = vld [vmem:[#allocation19] sm:$0xff]  }
 0x157   :  { %1575 = vmatprep.subr.bf16.mxu1 %v2258_v0  ;;  %v1805_v63 = vld [vmem:[#allocation16 + $0x38] sm:$0xff]   ;;  %v1807_v2 = vld [vmem:[#allocation19 + $0x8] sm:$0xff]   ;;  %v1810_v5 = vld [vmem:[#allocation19 + $0x20] sm:$0xff]  }
 0x158   :  { %v1808_v3 = vld [vmem:[#allocation19 + $0x10] sm:$0xff]   ;;  %v1809_v4 = vld [vmem:[#allocation19 + $0x18] sm:$0xff]   ;;  %v1811_v6 = vld [vmem:[#allocation19 + $0x28] sm:$0xff]  }
 0x159   :  { %1594 = vmatpush3.bf16.msra.mxu0 %v1783_v14 }
 0x15a   :  { %1576 = vmatpush3.bf16.msra.mxu1 %v1776_v7  ;;  %1595 = vmatprep.subr.bf16.mxu0 %v2258_v0  ;;  %v1812_v7 = vld [vmem:[#allocation19 + $0x30] sm:$0xff]  }
 0x15b   :  { %1577 = vmatprep.subr.bf16.mxu1 %v2258_v0 }
 0x15d   :  { %1596 = vmatpush3.bf16.msra.mxu0 %v1784_v15 }
 0x15e   :  { %1578 = vmatpush3.bf16.msra.mxu1 %v1777_v8  ;;  %1597 = vmatprep.subr.bf16.mxu0 %v2258_v0  ;;  %v1416_v8 = vld [vmem:[#allocation14] ss:$0 sm:$0xff] }
 0x15f   :  { %1579 = vmatprep.subr.bf16.mxu1 %v2258_v0 }
 0x161   :  { %1598 = vmatpush3.bf16.msra.mxu0 %v1785_v16 }
 0x162   :  { %1580 = vmatpush3.bf16.msra.mxu1 %v1778_v9  ;;  %1599 = vmatprep.subr.bf16.mxu0 %v2258_v0 }
 0x163   :  { %1581 = vmatprep.subr.bf16.mxu1 %v2258_v0 }
 0x165   :  { %1600 = vmatpush3.bf16.msra.mxu0 %v1786_v17  ;;  %v1813_v17 = vld [vmem:[#allocation19 + $0x38] sm:$0xff]  }
 0x166   :  { %1582 = vmatpush3.bf16.msra.mxu1 %v1779_v10  ;;  %1601 = vmatprep.subr.bf16.mxu0 %v2258_v0 }
 0x167   :  { %1583 = vmatprep.subr.bf16.mxu1 %v2258_v0 }
 0x169   :  { %1602 = vmatpush3.bf16.msra.mxu0 %v1787_v18  ;;  %v1814_v18 = vld [vmem:[%s2783_s13] sm:$0xff]  }
 0x16a   :  { %1584 = vmatpush3.bf16.msra.mxu1 %v1780_v11  ;;  %1603 = vmatprep.subr.bf16.mxu0 %v2258_v0 }
 0x16b   :  { %1585 = vmatprep.subr.bf16.mxu1 %v2258_v0 }
 0x16d   :  { %1604 = vmatpush3.bf16.msra.mxu0 %v1788_v28 }
 0x16e   :  { %1586 = vmatpush3.bf16.msra.mxu1 %v1781_v12  ;;  %1605 = vmatprep.subr.bf16.mxu0 %v2258_v0 }
 0x16f   :  { %1611 = vmatprep.subr.bf16.mxu1 %v2258_v0 }
 0x171   :  { %1606 = vmatpush3.bf16.msra.mxu0 %v1789_v29 }
 0x172   :  { %1631 = vmatprep.subr.bf16.mxu0 %v2258_v0 }
 0x227   :  { %v332_v20 = vpop.f32.mrb[0].mxu0 }
 0x228   :  { %v333_v21 = vadd.f32 %v1394_v19, %v332_v20  ;;  %v1569_v22 = vpop.f32.mrb[1].mxu0  ;;  %v1815_v19 = vld [vmem:[%s2783_s13 + $0x8] sm:$0xff]   ;;  %v1816_v20 = vld [vmem:[%s2783_s13 + $0x10] sm:$0xff]  }
 0x229   :  { %v335_v23 = vpop.f32.mrb[2].mxu0  ;;  %v1818_v22 = vld [vmem:[%s2783_s13 + $0x20] sm:$0xff]  }
 0x22a   :  { %vm338_vm2 = vcmp.gt.f32.partialorder %v333_v21, 0.0  ;;  %v339_v24 = vmul.f32 0.1, %v333_v21  ;;  %v1570_v25 = vpop.f32.mrb[3].mxu0  ;;  %v1819_v23 = vld [vmem:[%s2783_s13 + $0x28] sm:$0xff]  }
 0x22c   :  { %v340_v26 = vsel %vm338_vm2, %v333_v21, %v339_v24  ;;  %v1817_v21 = vld [vmem:[%s2783_s13 + $0x18] sm:$0xff]   ;;  %v1425_v24 = vld [vmem:[#allocation17] ss:$0 sm:$0xff] }
 0x22d   :  { %v358_v27 = vpack.c.bf16 %v340_v26, %v340_v26 }
 0x22f   :  { %1588 = vmatmul.mubr.bf16.vlgmr.msra.gmra.mrb[0].mxu1 %v358_v27 }
 0x230   :  { %1627 = vmatprep.mubr.msk.bf16.mxu1 %vm2259_vm0, %v2258_v0  ;;  %1612 = vmatpush3.bf16.msra.mxu1 %v1790_v30 }
 0x231   :  { %1613 = vmatprep.subr.bf16.mxu1 %v2258_v0 }
 0x234   :  { %1614 = vmatpush3.bf16.msra.mxu1 %v1791_v31  ;;  %v1820_v31 = vld [vmem:[%s2783_s13 + $0x30] sm:$0xff]  }
 0x235   :  { %1615 = vmatprep.subr.bf16.mxu1 %v2258_v0 }
 0x238   :  { %1616 = vmatpush3.bf16.msra.mxu1 %v1792_v32  ;;  %v1821_v32 = vld [vmem:[%s2783_s13 + $0x38] sm:$0xff]  }
 0x239   :  { %1617 = vmatprep.subr.bf16.mxu1 %v2258_v0 }
 0x23c   :  { %1618 = vmatpush3.bf16.msra.mxu1 %v1793_v33  ;;  %v1822_v33 = vld [vmem:[#allocation23] sm:$0xff]  }
 0x23d   :  { %1619 = vmatprep.subr.bf16.mxu1 %v2258_v0 }
 0x240   :  { %1620 = vmatpush3.bf16.msra.mxu1 %v1794_v34  ;;  %v1823_v34 = vld [vmem:[#allocation23 + $0x8] sm:$0xff]  }
 0x241   :  { %1621 = vmatprep.subr.bf16.mxu1 %v2258_v0 }
 0x244   :  { %1622 = vmatpush3.bf16.msra.mxu1 %v1795_v35  ;;  %v1824_v35 = vld [vmem:[#allocation23 + $0x10] sm:$0xff]  }
 0x245   :  { %1623 = vmatprep.subr.bf16.mxu1 %v2258_v0 }
 0x248   :  { %1624 = vmatpush3.bf16.msra.mxu1 %v1796_v45 }
 0x249   :  { %1625 = vmatprep.subr.bf16.mxu1 %v2258_v0 }
 0x24c   :  { %1626 = vmatpush3.bf16.msra.mxu1 %v1797_v46 }
 0x24d   :  { %1651 = vmatprep.subr.bf16.mxu1 %v2258_v0 }
 0x302   :  { %v447_v37 = vpop.f32.mrb[0].mxu1 }
 0x303   :  { %v448_v38 = vadd.f32 %v1398_v36, %v447_v37  ;;  %v1589_v39 = vpop.f32.mrb[1].mxu1  ;;  %v1825_v36 = vld [vmem:[#allocation23 + $0x18] sm:$0xff]   ;;  %v1826_v37 = vld [vmem:[#allocation23 + $0x20] sm:$0xff]  }
 0x304   :  { %v450_v40 = vpop.f32.mrb[2].mxu1  ;;  %v1434_v39 = vld [vmem:[#allocation20] ss:$0 sm:$0xff] }
 0x305   :  { %vm453_vm3 = vcmp.gt.f32.partialorder %v448_v38, 0.0  ;;  %v454_v41 = vmul.f32 0.1, %v448_v38  ;;  %v1590_v42 = vpop.f32.mrb[3].mxu1 }
 0x307   :  { %v455_v43 = vsel %vm453_vm3, %v448_v38, %v454_v41  ;;  %v1827_v38 = vld [vmem:[#allocation23 + $0x28] sm:$0xff]  }
 0x308   :  { %v473_v44 = vpack.c.bf16 %v455_v43, %v455_v43 }
 0x30a   :  { %1608 = vmatmul.mubr.bf16.vlgmr.msra.gmra.mrb[4].mxu0 %v473_v44 }
 0x30b   :  { %1647 = vmatprep.mubr.msk.bf16.mxu0 %vm2259_vm0, %v2258_v0  ;;  %1632 = vmatpush3.bf16.msra.mxu0 %v1798_v47 }
 0x30c   :  { %1633 = vmatprep.subr.bf16.mxu0 %v2258_v0 }
 0x30f   :  { %1634 = vmatpush3.bf16.msra.mxu0 %v1799_v48  ;;  %v1828_v48 = vld [vmem:[#allocation23 + $0x30] sm:$0xff]  }
 0x310   :  { %1635 = vmatprep.subr.bf16.mxu0 %v2258_v0 }
 0x313   :  { %1636 = vmatpush3.bf16.msra.mxu0 %v1800_v49  ;;  %v1829_v49 = vld [vmem:[#allocation23 + $0x38] sm:$0xff]  }
 0x314   :  { %1637 = vmatprep.subr.bf16.mxu0 %v2258_v0 }
 0x317   :  { %1638 = vmatpush3.bf16.msra.mxu0 %v1801_v50  ;;  %v1830_v50 = vld [vmem:[#allocation26] sm:$0xff]  }
 0x318   :  { %1639 = vmatprep.subr.bf16.mxu0 %v2258_v0 }
 0x31b   :  { %1640 = vmatpush3.bf16.msra.mxu0 %v1802_v51  ;;  %v1831_v51 = vld [vmem:[#allocation26 + $0x8] sm:$0xff]  }
 0x31c   :  { %1641 = vmatprep.subr.bf16.mxu0 %v2258_v0 }
 0x31f   :  { %1642 = vmatpush3.bf16.msra.mxu0 %v1803_v52  ;;  %v1832_v52 = vld [vmem:[#allocation26 + $0x10] sm:$0xff]  }
 0x320   :  { %1643 = vmatprep.subr.bf16.mxu0 %v2258_v0 }
 0x323   :  { %1644 = vmatpush3.bf16.msra.mxu0 %v1804_v62 }
 0x324   :  { %1645 = vmatprep.subr.bf16.mxu0 %v2258_v0 }
 0x327   :  { %1646 = vmatpush3.bf16.msra.mxu0 %v1805_v63 }
 0x328   :  { %1671 = vmatprep.subr.bf16.mxu0 %v2258_v0 }
 0x3dd   :  { %v562_v54 = vpop.f32.mrb[4].mxu0 }
 0x3de   :  { %v563_v55 = vadd.f32 %v1407_v53, %v562_v54  ;;  %v1609_v56 = vpop.f32.mrb[5].mxu0  ;;  %v1833_v53 = vld [vmem:[#allocation26 + $0x18] sm:$0xff]   ;;  %v1834_v54 = vld [vmem:[#allocation26 + $0x20] sm:$0xff]  }
 0x3df   :  { %v565_v57 = vpop.f32.mrb[6].mxu0  ;;  %v1443_v56 = vld [vmem:[#allocation22] ss:$0 sm:$0xff] }
 0x3e0   :  { %vm568_vm4 = vcmp.gt.f32.partialorder %v563_v55, 0.0  ;;  %v569_v58 = vmul.f32 0.1, %v563_v55  ;;  %v1610_v59 = vpop.f32.mrb[7].mxu0 }
 0x3e2   :  { %v570_v60 = vsel %vm568_vm4, %v563_v55, %v569_v58  ;;  %v1835_v55 = vld [vmem:[#allocation26 + $0x28] sm:$0xff]  }
 0x3e3   :  { %v588_v61 = vpack.c.bf16 %v570_v60, %v570_v60 }
 0x3e5   :  { %1628 = vmatmul.mubr.bf16.vlgmr.msra.gmra.mrb[4].mxu1 %v588_v61 }
 0x3e6   :  { %1667 = vmatprep.mubr.msk.bf16.mxu1 %vm2259_vm0, %v2258_v0  ;;  %1652 = vmatpush3.bf16.msra.mxu1 %v1806_v1 }
 0x3e7   :  { %1653 = vmatprep.subr.bf16.mxu1 %v2258_v0 }
 0x3ea   :  { %1654 = vmatpush3.bf16.msra.mxu1 %v1807_v2  ;;  %v1836_v2 = vld [vmem:[#allocation26 + $0x30] sm:$0xff]  }
 0x3eb   :  { %1655 = vmatprep.subr.bf16.mxu1 %v2258_v0 }
 0x3ee   :  { %1656 = vmatpush3.bf16.msra.mxu1 %v1808_v3  ;;  %v1837_v3 = vld [vmem:[#allocation26 + $0x38] sm:$0xff]  }
 0x3ef   :  { %1657 = vmatprep.subr.bf16.mxu1 %v2258_v0 }
 0x3f2   :  { %1658 = vmatpush3.bf16.msra.mxu1 %v1809_v4  ;;  %v1838_v4 = vld [vmem:[%s2789_s19] sm:$0xff]  }
 0x3f3   :  { %1659 = vmatprep.subr.bf16.mxu1 %v2258_v0 }
 0x3f6   :  { %1660 = vmatpush3.bf16.msra.mxu1 %v1810_v5  ;;  %v1839_v5 = vld [vmem:[%s2789_s19 + $0x8] sm:$0xff]  }
 0x3f7   :  { %1661 = vmatprep.subr.bf16.mxu1 %v2258_v0 }
 0x3fa   :  { %1662 = vmatpush3.bf16.msra.mxu1 %v1811_v6  ;;  %v1840_v6 = vld [vmem:[%s2789_s19 + $0x10] sm:$0xff]  }
 0x3fb   :  { %1663 = vmatprep.subr.bf16.mxu1 %v2258_v0 }
 0x3fe   :  { %1664 = vmatpush3.bf16.msra.mxu1 %v1812_v7  ;;  %v1841_v7 = vld [vmem:[%s2789_s19 + $0x18] sm:$0xff]  }
 0x3ff   :  { %1665 = vmatprep.subr.bf16.mxu1 %v2258_v0 }
 0x402   :  { %1666 = vmatpush3.bf16.msra.mxu1 %v1813_v17 }
 0x403   :  { %1691 = vmatprep.subr.bf16.mxu1 %v2258_v0 }
 0x4b8   :  { %v677_v9 = vpop.f32.mrb[4].mxu1 }
 0x4b9   :  { %v678_v10 = vadd.f32 %v1416_v8, %v677_v9  ;;  %v1629_v11 = vpop.f32.mrb[5].mxu1  ;;  %v1842_v8 = vld [vmem:[%s2789_s19 + $0x20] sm:$0xff]   ;;  %v1843_v9 = vld [vmem:[%s2789_s19 + $0x28] sm:$0xff]  }
 0x4ba   :  { %v680_v12 = vpop.f32.mrb[6].mxu1 }
 0x4bb   :  { %vm683_vm5 = vcmp.gt.f32.partialorder %v678_v10, 0.0  ;;  %v684_v13 = vmul.f32 0.1, %v678_v10  ;;  %v1630_v14 = vpop.f32.mrb[7].mxu1 }
 0x4bd   :  { %v685_v15 = vsel %vm683_vm5, %v678_v10, %v684_v13  ;;  %v1452_v10 = vld [vmem:[#allocation25] ss:$0 sm:$0xff] }
 0x4be   :  { %v703_v16 = vpack.c.bf16 %v685_v15, %v685_v15 }
 0x4c0   :  { %1648 = vmatmul.mubr.bf16.vlgmr.msra.gmra.mrb[8].mxu0 %v703_v16 }
 0x4c1   :  { %1687 = vmatprep.mubr.msk.bf16.mxu0 %vm2259_vm0, %v2258_v0  ;;  %1672 = vmatpush3.bf16.msra.mxu0 %v1814_v18 }
 0x4c2   :  { %1673 = vmatprep.subr.bf16.mxu0 %v2258_v0 }
 0x4c5   :  { %1674 = vmatpush3.bf16.msra.mxu0 %v1815_v19  ;;  %v1844_v19 = vld [vmem:[%s2789_s19 + $0x30] sm:$0xff]  }
 0x4c6   :  { %1675 = vmatprep.subr.bf16.mxu0 %v2258_v0 }
 0x4c9   :  { %1676 = vmatpush3.bf16.msra.mxu0 %v1816_v20  ;;  %v1845_v20 = vld [vmem:[%s2789_s19 + $0x38] sm:$0xff]   ;;  %s2260_s19 = smov [#allocation28]  }
 0x4ca   :  { %1677 = vmatprep.subr.bf16.mxu0 %v2258_v0  ;;  %s1377_s27 = sshll.u32 %s2260_s19, 4  ;;  %s1378_s27 = int_to_ptr.vmem [resolvable:$true] %s1377_s27 }
 0x4cb   :  { %s2198_s11 = scalar_lea.vmem %s1378_s27, 128  ;;  %p2203_p3 = scmp.lt.s32.totalorder %s1378_s27, %s1378_s27 }
 0x4cc   :  { %p2199_p2 = scmp.ne.s32.totalorder %s1378_s27, %s2198_s11  ;;  %p2204_p4 = scmp.lt.s32.totalorder %s2198_s11, %s2198_s11 }
 0x4cd   :  { %1678 = vmatpush3.bf16.msra.mxu0 %v1817_v21  ;;  %v1461_v21 = vld [vmem:[%s2814_s30] ss:$0 sm:$0xff] }
 0x4ce   :  { %1679 = vmatprep.subr.bf16.mxu0 %v2258_v0  ;;  %p2205_p5 = por %p2204_p4, %p2203_p3 }
 0x4d0   :  { %p2206_p6 = pnand %p2205_p5, %p2199_p2 }
 0x4d1   :  { %1680 = vmatpush3.bf16.msra.mxu0 %v1818_v22 }
 0x4d2   :  { %1681 = vmatprep.subr.bf16.mxu0 %v2258_v0 }
 0x4d5   :  { %1682 = vmatpush3.bf16.msra.mxu0 %v1819_v23 }
 0x4d6   :  { %1683 = vmatprep.subr.bf16.mxu0 %v2258_v0 }
 0x4d9   :  { %1684 = vmatpush3.bf16.msra.mxu0 %v1820_v31 }
 0x4da   :  { %1685 = vmatprep.subr.bf16.mxu0 %v2258_v0 }
 0x4dd   :  { %1686 = vmatpush3.bf16.msra.mxu0 %v1821_v32 }
 0x4de   :  { %1711 = vmatprep.subr.bf16.mxu0 %v2258_v0 }
 0x593   :  { %v792_v25 = vpop.f32.mrb[8].mxu0 }
 0x594   :  { %v793_v26 = vadd.f32 %v1425_v24, %v792_v25  ;;  %v1649_v27 = vpop.f32.mrb[9].mxu0 }
 0x595   :  { %v795_v28 = vpop.f32.mrb[10].mxu0 }
 0x596   :  { %v815_v29 = vpack.c.bf16 %v793_v26, %v793_v26  ;;  %v1650_v30 = vpop.f32.mrb[11].mxu0 }
 0x598   :  { %1668 = vmatmul.mubr.bf16.vlgmr.msra.gmra.mrb[8].mxu1 %v815_v29 }
 0x599   :  { %1707 = vmatprep.mubr.msk.bf16.mxu1 %vm2259_vm0, %v2258_v0  ;;  %1692 = vmatpush3.bf16.msra.mxu1 %v1822_v33 }
 0x59a   :  { %1693 = vmatprep.subr.bf16.mxu1 %v2258_v0 }
 0x59d   :  { %1694 = vmatpush3.bf16.msra.mxu1 %v1823_v34 }
 0x59e   :  { %1695 = vmatprep.subr.bf16.mxu1 %v2258_v0 }
 0x5a1   :  { %1696 = vmatpush3.bf16.msra.mxu1 %v1824_v35 }
 0x5a2   :  { %1697 = vmatprep.subr.bf16.mxu1 %v2258_v0 }
 0x5a5   :  { %1698 = vmatpush3.bf16.msra.mxu1 %v1825_v36 }
 0x5a6   :  { %1699 = vmatprep.subr.bf16.mxu1 %v2258_v0 }
 0x5a9   :  { %1700 = vmatpush3.bf16.msra.mxu1 %v1826_v37 }
 0x5aa   :  { %1701 = vmatprep.subr.bf16.mxu1 %v2258_v0 }
 0x5ad   :  { %1702 = vmatpush3.bf16.msra.mxu1 %v1827_v38 }
 0x5ae   :  { %1703 = vmatprep.subr.bf16.mxu1 %v2258_v0 }
 0x5b1   :  { %1704 = vmatpush3.bf16.msra.mxu1 %v1828_v48 }
 0x5b2   :  { %1705 = vmatprep.subr.bf16.mxu1 %v2258_v0 }
 0x5b5   :  { %1706 = vmatpush3.bf16.msra.mxu1 %v1829_v49 }
 0x5b6   :  { %1731 = vmatprep.subr.bf16.mxu1 %v2258_v0 }
 0x66b   :  { %v904_v40 = vpop.f32.mrb[8].mxu1 }
 0x66c   :  { %v905_v41 = vadd.f32 %v1434_v39, %v904_v40  ;;  %v1669_v42 = vpop.f32.mrb[9].mxu1 }
 0x66d   :  { %v907_v43 = vpop.f32.mrb[10].mxu1 }
 0x66e   :  { %vm910_vm6 = vcmp.gt.f32.partialorder %v905_v41, 0.0  ;;  %v911_v44 = vmul.f32 0.1, %v905_v41  ;;  %v1670_v45 = vpop.f32.mrb[11].mxu1 }
 0x670   :  { %v912_v46 = vsel %vm910_vm6, %v905_v41, %v911_v44 }
 0x671   :  { %v930_v47 = vpack.c.bf16 %v912_v46, %v912_v46 }
 0x673   :  { %1688 = vmatmul.mubr.bf16.vlgmr.msra.gmra.mrb[12].mxu0 %v930_v47 }
 0x674   :  { %1727 = vmatprep.mubr.msk.bf16.mxu0 %vm2259_vm0, %v2258_v0  ;;  %1712 = vmatpush3.bf16.msra.mxu0 %v1830_v50 }
 0x675   :  { %1713 = vmatprep.subr.bf16.mxu0 %v2258_v0 }
 0x678   :  { %1714 = vmatpush3.bf16.msra.mxu0 %v1831_v51 }
 0x679   :  { %1715 = vmatprep.subr.bf16.mxu0 %v2258_v0 }
 0x67c   :  { %1716 = vmatpush3.bf16.msra.mxu0 %v1832_v52 }
 0x67d   :  { %1717 = vmatprep.subr.bf16.mxu0 %v2258_v0 }
 0x680   :  { %1718 = vmatpush3.bf16.msra.mxu0 %v1833_v53 }
 0x681   :  { %1719 = vmatprep.subr.bf16.mxu0 %v2258_v0 }
 0x684   :  { %1720 = vmatpush3.bf16.msra.mxu0 %v1834_v54 }
 0x685   :  { %1721 = vmatprep.subr.bf16.mxu0 %v2258_v0 }
 0x688   :  { %1722 = vmatpush3.bf16.msra.mxu0 %v1835_v55 }
 0x689   :  { %1723 = vmatprep.subr.bf16.mxu0 %v2258_v0 }
 0x68c   :  { %1724 = vmatpush3.bf16.msra.mxu0 %v1836_v2 }
 0x68d   :  { %1725 = vmatprep.subr.bf16.mxu0 %v2258_v0 }
 0x690   :  { %1726 = vmatpush3.bf16.msra.mxu0 %v1837_v3 }
 0x746   :  { %v1019_v57 = vpop.f32.mrb[12].mxu0 }
 0x747   :  { %v1020_v58 = vadd.f32 %v1443_v56, %v1019_v57  ;;  %v1689_v59 = vpop.f32.mrb[13].mxu0 }
 0x748   :  { %v1022_v60 = vpop.f32.mrb[14].mxu0 }
 0x749   :  { %vm1025_vm7 = vcmp.gt.f32.partialorder %v1020_v58, 0.0  ;;  %v1026_v61 = vmul.f32 0.1, %v1020_v58  ;;  %v1690_v62 = vpop.f32.mrb[15].mxu0 }
 0x74b   :  { %v1027_v63 = vsel %vm1025_vm7, %v1020_v58, %v1026_v61 }
 0x74c   :  { %v1045_v1 = vpack.c.bf16 %v1027_v63, %v1027_v63 }
 0x74e   :  { %1708 = vmatmul.mubr.bf16.vlgmr.msra.gmra.mrb[12].mxu1 %v1045_v1 }
 0x74f   :  { %1747 = vmatprep.mubr.msk.bf16.mxu1 %vm2259_vm0, %v2258_v0  ;;  %1732 = vmatpush3.bf16.msra.mxu1 %v1838_v4 }
 0x750   :  { %1733 = vmatprep.subr.bf16.mxu1 %v2258_v0 }
 0x753   :  { %1734 = vmatpush3.bf16.msra.mxu1 %v1839_v5 }
 0x754   :  { %1735 = vmatprep.subr.bf16.mxu1 %v2258_v0 }
 0x757   :  { %1736 = vmatpush3.bf16.msra.mxu1 %v1840_v6 }
 0x758   :  { %1737 = vmatprep.subr.bf16.mxu1 %v2258_v0 }
 0x75b   :  { %1738 = vmatpush3.bf16.msra.mxu1 %v1841_v7 }
 0x75c   :  { %1739 = vmatprep.subr.bf16.mxu1 %v2258_v0 }
 0x75f   :  { %1740 = vmatpush3.bf16.msra.mxu1 %v1842_v8 }
 0x760   :  { %1741 = vmatprep.subr.bf16.mxu1 %v2258_v0 }
 0x763   :  { %1742 = vmatpush3.bf16.msra.mxu1 %v1843_v9 }
 0x764   :  { %1743 = vmatprep.subr.bf16.mxu1 %v2258_v0 }
 0x767   :  { %1744 = vmatpush3.bf16.msra.mxu1 %v1844_v19 }
 0x768   :  { %1745 = vmatprep.subr.bf16.mxu1 %v2258_v0  ;;  %v1470_v0 = vld [vmem:[%s2815_s7] ss:$0 sm:$0xff] }
 0x76b   :  { %1746 = vmatpush3.bf16.msra.mxu1 %v1845_v20 }
 0x821   :  { %v1134_v11 = vpop.f32.mrb[12].mxu1 }
 0x822   :  { %v1135_v12 = vadd.f32 %v1452_v10, %v1134_v11  ;;  %v1709_v13 = vpop.f32.mrb[13].mxu1 }
 0x823   :  { %v1137_v14 = vpop.f32.mrb[14].mxu1 }
 0x824   :  { %vm1140_vm8 = vcmp.gt.f32.partialorder %v1135_v12, 0.0  ;;  %v1141_v15 = vmul.f32 0.1, %v1135_v12  ;;  %v1710_v16 = vpop.f32.mrb[15].mxu1 }
 0x826   :  { %v1142_v17 = vsel %vm1140_vm8, %v1135_v12, %v1141_v15 }
 0x827   :  { %v1160_v18 = vpack.c.bf16 %v1142_v17, %v1142_v17 }
 0x829   :  { %1728 = vmatmul.mubr.bf16.vlgmr.msra.gmra.mrb[16].mxu0 %v1160_v18 }
 0x8fc   :  { %v1249_v22 = vpop.f32.mrb[16].mxu0 }
 0x8fd   :  { %v1250_v23 = vadd.f32 %v1461_v21, %v1249_v22  ;;  %v1729_v24 = vpop.f32.mrb[17].mxu0 }
 0x8fe   :  { %v1252_v25 = vpop.f32.mrb[18].mxu0 }
 0x8ff   :  { %vm1255_vm9 = vcmp.gt.f32.partialorder %v1250_v23, 0.0  ;;  %v1256_v26 = vmul.f32 0.1, %v1250_v23  ;;  %v1730_v27 = vpop.f32.mrb[19].mxu0 }
 0x901   :  { %v1257_v28 = vsel %vm1255_vm9, %v1250_v23, %v1256_v26 }
 0x902   :  { %v1275_v29 = vpack.c.bf16 %v1257_v28, %v1257_v28 }
 0x904   :  { %1748 = vmatmul.mubr.bf16.vlgmr.msra.gmra.mrb[16].mxu1 %v1275_v29 }
 0x9d7   :  { %v1364_v30 = vpop.f32.mrb[16].mxu1 }
 0x9d8   :  { %v1365_v31 = vadd.f32 %v1470_v0, %v1364_v30  ;;  %v1749_v32 = vpop.f32.mrb[17].mxu1 }
 0x9d9   :  { %v1367_v33 = vpop.f32.mrb[18].mxu1 }
 0x9da   :  { %1370 = vst.msk [vmem:[#allocation28] sm:$0xff] %vm294_vm1, %v1365_v31  ;;  %v1750_v34 = vpop.f32.mrb[19].mxu1 }
 0x9db   :  { %2209 = shalt.err (!%p2206_p6)
}
 0x9dc   :  { %s2816_s17 = sld [smem:[#allocation47_spill]] }
 0x9e2   :  { %s2210_s22 = scalar_lea.hbm %s2816_s17, 128 }
 0x9e3   :  { %p2211_p7 = scmp.ne.s32.totalorder %s2816_s17, %s2210_s22  ;;  %p2214_p8 = scmp.lt.u32.totalorder %s2210_s22, %s2816_s17 }
 0x9e5   :  { %p2216_p9 = pnand %p2214_p8, %p2211_p7 }
 0x9e7   :  { %2219 = shalt.err (!%p2216_p9)
}
 0x9e8   :  { %1380 = dma.vmem_to_hbm [thread:$0]  %s1378_s27, 128, %s2816_s17, [#allocation4]  }
 0x9e9   :  { %2238 = dma.done.wait [#allocation4], 128  }
 0x9ea   :  { %2239 = vsyncadd [#allocation4], 4294967168 }
 0x9eb   :  { %1384 = vsyncpa [#allocation3], 1 }
 0x9ec   :  { %1385 = vsyncpa [#allocation6], 1 }
 0x9ed   :  { %1386 = vsyncpa [#allocation9], 1 }
 0x9ee   :  { %1387 = vsyncpa [#allocation12], 1 }
 0x9ef   :  { %1388 = vsyncpa [#allocation15], 1 }
 0x9f0   :  { %1389 = vsyncpa [#allocation18], 1 }
 0x9f1   :  { %1390 = vsyncpa [#allocation21], 1 }
 0x9f2   :  { %1391 = vsyncpa [#allocation24], 1 }
 0x9f3   :  { %1392 = vsyncpa [#allocation27], 1 }
 0x9f4   :  { %1393 = vsyncpa [#allocation4], 1 }

</bundles_post_ra>
